<compile_context>
chip_gen: v7x
topology: tpu7x:2x2x1
jax: 0.10.0
libtpu: 0.0.40
codegen_flags: <defaults>
</compile_context>

<pallas_src>
import functools

import jax
import jax.numpy as jnp
from jax import lax
from jax.experimental import pallas as pl
from jax.experimental.pallas import tpu as pltpu

BN_EPS = 1e-5


def _csa_kernel(x_ref, w1_ref, b1_ref, w2_ref, b2_ref,
                sw1_ref, sb1_ref, sw2_ref, sb2_ref,
                out_ref, *, H, W):
    # x_ref  : (Nb, C, HW)  VMEM input block (lane-dense, single copy)
    # w1_ref : (Cr, C), b1_ref: (1, Cr), w2_ref: (C, Cr), b2_ref: (1, C)   (BN folded)
    # sw1_ref: (Cr*9,), sb1_ref: (Cr,), sw2_ref: (Cr*9,), sb2_ref: (1,)    SMEM (BN folded)
    # out_ref: (Nb, C, HW)  VMEM output block — written exactly once.
    Nb, C, HW = x_ref.shape
    Cr = w1_ref.shape[0]

    x = x_ref[...].astype(jnp.float32)                          # (Nb, C, HW)

    # ---------- channel attention: 1x1 convs on the spatial mean (VPU only) ----------
    m = jnp.sum(x, axis=-1) * (1.0 / HW)                        # (Nb, C)
    h = jnp.sum(m[:, None, :] * w1_ref[...][None, :, :], axis=-1) + b1_ref[...]   # (Nb, Cr)
    h = jnp.maximum(h, 0.0)                                     # ReLU
    ca = jnp.sum(h[:, None, :] * w2_ref[...][None, :, :], axis=-1) + b2_ref[...]  # (Nb, C)
    ca = jax.nn.sigmoid(ca)

    # ---------- apply channel attention; channel-mean map for spatial attention ----------
    x1 = x * ca[:, :, None]                                     # (Nb, C, HW), kept in f32
    s = jnp.sum(x1, axis=1) * (1.0 / C)                         # (Nb, HW)

    # ---------- spatial attention: two 3x3 "same" convs via flat shifted adds ----------
    # Neighbour (dy, dx) in 2D == flat shift of dy*W + dx. Row wrap along x is
    # masked (dx = +/-1); out-of-range flat indices are zero-filled by the concat.
    col = lax.broadcasted_iota(jnp.int32, (Nb, HW), 1) % W
    not_left = (col != 0).astype(jnp.float32)                   # valid only when x >= 1
    not_right = (col != W - 1).astype(jnp.float32)              # valid only when x <= W-2

    def shifted(v, dy, dx):
        k = dy * W + dx
        if k == 0:
            t = v
        elif k > 0:
            t = jnp.concatenate([v[:, k:], jnp.zeros((Nb, k), jnp.float32)], axis=1)
        else:
            t = jnp.concatenate([jnp.zeros((Nb, -k), jnp.float32), v[:, :HW + k]], axis=1)
        if dx == -1:
            t = t * not_left
        elif dx == 1:
            t = t * not_right
        return t

    # The 9 shifted copies of the channel-mean map are shared by every hidden channel.
    s_sh = [shifted(s, ky - 1, kx - 1) for ky in range(3) for kx in range(3)]

    acc2 = jnp.full((Nb, HW), sb2_ref[0], jnp.float32)
    for oc in range(Cr):
        acc1 = jnp.full((Nb, HW), sb1_ref[oc], jnp.float32)
        for t in range(9):
            acc1 = acc1 + sw1_ref[oc * 9 + t] * s_sh[t]
        hid = jnp.maximum(acc1, 0.0)                            # ReLU
        for ky in range(3):
            for kx in range(3):
                acc2 = acc2 + sw2_ref[oc * 9 + ky * 3 + kx] * shifted(hid, ky - 1, kx - 1)
    sa = jax.nn.sigmoid(acc2)                                   # (Nb, HW)

    # ---------- single fused lane-dense store: out = x * ca * sa ----------
    out_ref[...] = (x1 * sa[:, None, :]).astype(out_ref.dtype)


def _choose_batch_block(N, C, HW, itemsize, target_bytes=2 << 20, min_grid=2):
    """Largest divisor of N whose input block stays under target_bytes while keeping
    >= min_grid grid steps when N allows it (v7x has 2 TensorCores per chip)."""
    max_nb = max(1, target_bytes // max(1, C * HW * itemsize))
    if N >= min_grid:
        max_nb = min(max_nb, N // min_grid)
    nb = 1
    for cand in range(1, min(N, max_nb) + 1):
        if N % cand == 0:
            nb = cand
    return nb


def channel_spatial_attention(x, p, *, batch_block=None):
    N, C, H, W = x.shape
    HW = H * W
    Cr = p["ca_w1"].shape[0]
    eps = BN_EPS

    # ---- fold eval-mode BatchNorm into conv weights/biases (plain-JAX glue) ----
    s1 = p["ca_bn1_g"] / jnp.sqrt(p["ca_bn1_v"] + eps)
    W1p = p["ca_w1"] * s1[:, None]                                          # (Cr, C)
    B1p = (s1 * (p["ca_b1"] - p["ca_bn1_m"]) + p["ca_bn1_b"])[None, :]      # (1, Cr)
    s2 = p["ca_bn2_g"] / jnp.sqrt(p["ca_bn2_v"] + eps)
    W2p = p["ca_w2"] * s2[:, None]                                          # (C, Cr)
    B2p = (s2 * (p["ca_b2"] - p["ca_bn2_m"]) + p["ca_bn2_b"])[None, :]      # (1, C)

    t1 = p["sa_bn1_g"] / jnp.sqrt(p["sa_bn1_v"] + eps)
    SW1p = (p["sa_w1"][:, 0] * t1[:, None, None]).reshape(Cr * 9)           # (Cr*9,)
    SB1p = t1 * (p["sa_b1"] - p["sa_bn1_m"]) + p["sa_bn1_b"]                # (Cr,)
    t2 = p["sa_bn2_g"] / jnp.sqrt(p["sa_bn2_v"] + eps)
    SW2p = (p["sa_w2"][0] * t2[0]).reshape(Cr * 9)                          # (Cr*9,)
    SB2p = t2 * (p["sa_b2"] - p["sa_bn2_m"]) + p["sa_bn2_b"]                # (1,)

    # Single lane-dense view of the input (free XLA reshape); no duplicate copy.
    xf = x.reshape(N, C, HW)

    nb = batch_block if batch_block is not None else _choose_batch_block(
        N, C, HW, x.dtype.itemsize)
    grid = (N // nb,)

    kernel = functools.partial(_csa_kernel, H=H, W=W)
    out_flat = pl.pallas_call(
        kernel,
        out_shape=jax.ShapeDtypeStruct((N, C, HW), x.dtype),
        grid_spec=pltpu.PrefetchScalarGridSpec(
            num_scalar_prefetch=0,
            grid=grid,
            in_specs=[
                pl.BlockSpec((nb, C, HW), lambda n: (n, 0, 0)),
                pl.BlockSpec((Cr, C), lambda n: (0, 0)),
                pl.BlockSpec((1, Cr), lambda n: (0, 0)),
                pl.BlockSpec((C, Cr), lambda n: (0, 0)),
                pl.BlockSpec((1, C), lambda n: (0, 0)),
                pl.BlockSpec(memory_space=pltpu.MemorySpace.SMEM),
                pl.BlockSpec(memory_space=pltpu.MemorySpace.SMEM),
                pl.BlockSpec(memory_space=pltpu.MemorySpace.SMEM),
                pl.BlockSpec(memory_space=pltpu.MemorySpace.SMEM),
            ],
            out_specs=pl.BlockSpec((nb, C, HW), lambda n: (n, 0, 0)),
        ),
        compiler_params=pltpu.CompilerParams(dimension_semantics=("parallel",)),
    )(xf, W1p, B1p, W2p, B2p, SW1p, SB1p, SW2p, SB2p)
    return out_flat.reshape(N, C, H, W)


def init_params(key, C, ratio=8):
    Cr = C // ratio
    ks = jax.random.split(key, 24)
    n = lambda k, s, sc=0.5: sc * jax.random.normal(k, s, jnp.float32)
    u = lambda k, s: jax.random.uniform(k, s, jnp.float32, 0.5, 1.5)
    return dict(
        ca_w1=n(ks[0], (Cr, C)), ca_b1=n(ks[1], (Cr,), 0.1),
        ca_bn1_g=u(ks[2], (Cr,)), ca_bn1_b=n(ks[3], (Cr,), 0.1),
        ca_bn1_m=n(ks[4], (Cr,), 0.1), ca_bn1_v=u(ks[5], (Cr,)),
        ca_w2=n(ks[6], (C, Cr)), ca_b2=n(ks[7], (C,), 0.1),
        ca_bn2_g=u(ks[8], (C,)), ca_bn2_b=n(ks[9], (C,), 0.1),
        ca_bn2_m=n(ks[10], (C,), 0.1), ca_bn2_v=u(ks[11], (C,)),
        sa_w1=n(ks[12], (Cr, 1, 3, 3)), sa_b1=n(ks[13], (Cr,), 0.1),
        sa_bn1_g=u(ks[14], (Cr,)), sa_bn1_b=n(ks[15], (Cr,), 0.1),
        sa_bn1_m=n(ks[16], (Cr,), 0.1), sa_bn1_v=u(ks[17], (Cr,)),
        sa_w2=n(ks[18], (1, Cr, 3, 3)), sa_b2=n(ks[19], (1,), 0.1),
        sa_bn2_g=u(ks[20], (1,)), sa_bn2_b=n(ks[21], (1,), 0.1),
        sa_bn2_m=n(ks[22], (1,), 0.1), sa_bn2_v=u(ks[23], (1,)),
    )


def ref_forward(x, p):
    eps = BN_EPS

    def bn(y, g, b, m, v):
        sc = (g / jnp.sqrt(v + eps))[None, :, None, None]
        return (y - m[None, :, None, None]) * sc + b[None, :, None, None]

    mc = jnp.mean(x, axis=(2, 3), keepdims=True)
    y = jnp.einsum("nchw,oc->nohw", mc, p["ca_w1"]) + p["ca_b1"][None, :, None, None]
    y = jax.nn.relu(bn(y, p["ca_bn1_g"], p["ca_bn1_b"], p["ca_bn1_m"], p["ca_bn1_v"]))
    y = jnp.einsum("nchw,oc->nohw", y, p["ca_w2"]) + p["ca_b2"][None, :, None, None]
    ca = jax.nn.sigmoid(bn(y, p["ca_bn2_g"], p["ca_bn2_b"], p["ca_bn2_m"], p["ca_bn2_v"]))
    x1 = ca * x

    s = jnp.mean(x1, axis=1, keepdims=True)
    dn = ("NCHW", "OIHW", "NCHW")
    z = lax.conv_general_dilated(s, p["sa_w1"], (1, 1), "SAME", dimension_numbers=dn)
    z = z + p["sa_b1"][None, :, None, None]
    z = jax.nn.relu(bn(z, p["sa_bn1_g"], p["sa_bn1_b"], p["sa_bn1_m"], p["sa_bn1_v"]))
    z = lax.conv_general_dilated(z, p["sa_w2"], (1, 1), "SAME", dimension_numbers=dn)
    z = z + p["sa_b2"][None, :, None, None]
    sa = jax.nn.sigmoid(bn(z, p["sa_bn2_g"], p["sa_bn2_b"], p["sa_bn2_m"], p["sa_bn2_v"]))
    return sa * x1


if __name__ == "__main__":
    key = jax.random.PRNGKey(0)
    kx, kp = jax.random.split(key)
    N, C, H, W = 2, 16, 16, 16          # ratio=8 -> hidden channels Cr=2
    x = jax.random.normal(kx, (N, C, H, W), jnp.float32)
    params = init_params(kp, C, ratio=8)

    out = channel_spatial_attention(x, params)
    out = jax.block_until_ready(out)

    ref = ref_forward(x, params)
    assert out.shape == (N, C, H, W)
    if not jnp.allclose(out, ref, atol=1e-3, rtol=1e-3):
        raise AssertionError(
            f"mismatch vs reference, max abs diff = {jnp.max(jnp.abs(out - ref))}")
    print("KERNEL_OK")
</pallas_src>

<mosaic_0001>
module attributes {stable_mosaic.version = 11 : i64} {
  func.func @_csa_kernel(%arg0: i32, %arg1: memref<1x16x256xf32, #tpu.memory_space<vmem>>, %arg2: memref<2x16xf32, #tpu.memory_space<vmem>>, %arg3: memref<1x2xf32, #tpu.memory_space<vmem>>, %arg4: memref<16x2xf32, #tpu.memory_space<vmem>>, %arg5: memref<1x16xf32, #tpu.memory_space<vmem>>, %arg6: memref<18xf32, #tpu.memory_space<smem>>, %arg7: memref<2xf32, #tpu.memory_space<smem>>, %arg8: memref<18xf32, #tpu.memory_space<smem>>, %arg9: memref<1xf32, #tpu.memory_space<smem>>, %arg10: memref<1x16x256xf32, #tpu.memory_space<vmem>>) attributes {dimension_semantics = [#tpu.dimension_semantics<parallel>], iteration_bounds = array<i64: 2>, scalar_prefetch = 0 : i64, scratch_operands = 0 : i64, tpu.core_type = #tpu.core_type<tc>, window_params = [{transform_indices = @transform_0, window_bounds = array<i64: 1, 16, 256>}, {pipeline_mode = #tpu.pipeline_mode<synchronous>, transform_indices = @transform_1, window_bounds = array<i64: 2, 16>}, {pipeline_mode = #tpu.pipeline_mode<synchronous>, transform_indices = @transform_2, window_bounds = array<i64: 1, 2>}, {pipeline_mode = #tpu.pipeline_mode<synchronous>, transform_indices = @transform_3, window_bounds = array<i64: 16, 2>}, {pipeline_mode = #tpu.pipeline_mode<synchronous>, transform_indices = @transform_4, window_bounds = array<i64: 1, 16>}, {transform_indices = @transform_5, window_bounds = array<i64: 18>}, {transform_indices = @transform_6, window_bounds = array<i64: 2>}, {transform_indices = @transform_7, window_bounds = array<i64: 18>}, {transform_indices = @transform_8, window_bounds = array<i64: 1>}, {transform_indices = @transform_9, window_bounds = array<i64: 1, 16, 256>}]} {
    %c0 = arith.constant 0 : index
    %c0_0 = arith.constant 0 : index
    %c0_1 = arith.constant 0 : index
    %0 = vector.load %arg1[%c0, %c0_0, %c0_1] : memref<1x16x256xf32, #tpu.memory_space<vmem>>, vector<1x16x256xf32>
    %cst = arith.constant dense<0.000000e+00> : vector<1x16xf32>
    %1 = vector.multi_reduction <add>, %0, %cst [2] : vector<1x16x256xf32> to vector<1x16xf32>
    %cst_2 = arith.constant 3.906250e-03 : f32
    %2 = vector.broadcast %cst_2 : f32 to vector<1x16xf32>
    %3 = arith.mulf %1, %2 : vector<1x16xf32>
    %4 = vector.shape_cast %3 : vector<1x16xf32> to vector<1x1x16xf32>
    %c0_3 = arith.constant 0 : index
    %c0_4 = arith.constant 0 : index
    %5 = vector.load %arg2[%c0_3, %c0_4] : memref<2x16xf32, #tpu.memory_space<vmem>>, vector<2x16xf32>
    %6 = vector.shape_cast %5 : vector<2x16xf32> to vector<1x2x16xf32>
    %7 = vector.broadcast %4 : vector<1x1x16xf32> to vector<1x2x16xf32>
    %8 = arith.mulf %7, %6 : vector<1x2x16xf32>
    %cst_5 = arith.constant dense<0.000000e+00> : vector<1x2xf32>
    %9 = vector.multi_reduction <add>, %8, %cst_5 [2] : vector<1x2x16xf32> to vector<1x2xf32>
    %c0_6 = arith.constant 0 : index
    %c0_7 = arith.constant 0 : index
    %10 = vector.load %arg3[%c0_6, %c0_7] : memref<1x2xf32, #tpu.memory_space<vmem>>, vector<1x2xf32>
    %11 = arith.addf %9, %10 : vector<1x2xf32>
    %cst_8 = arith.constant 0.000000e+00 : f32
    %12 = vector.broadcast %cst_8 : f32 to vector<1x2xf32>
    %13 = arith.maximumf %11, %12 : vector<1x2xf32>
    %14 = vector.shape_cast %13 : vector<1x2xf32> to vector<1x1x2xf32>
    %c0_9 = arith.constant 0 : index
    %c0_10 = arith.constant 0 : index
    %15 = vector.load %arg4[%c0_9, %c0_10] : memref<16x2xf32, #tpu.memory_space<vmem>>, vector<16x2xf32>
    %16 = vector.shape_cast %15 : vector<16x2xf32> to vector<1x16x2xf32>
    %17 = vector.broadcast %14 : vector<1x1x2xf32> to vector<1x16x2xf32>
    %18 = arith.mulf %17, %16 : vector<1x16x2xf32>
    %cst_11 = arith.constant dense<0.000000e+00> : vector<1x16xf32>
    %19 = vector.multi_reduction <add>, %18, %cst_11 [2] : vector<1x16x2xf32> to vector<1x16xf32>
    %c0_12 = arith.constant 0 : index
    %c0_13 = arith.constant 0 : index
    %20 = vector.load %arg5[%c0_12, %c0_13] : memref<1x16xf32, #tpu.memory_space<vmem>>, vector<1x16xf32>
    %21 = arith.addf %19, %20 : vector<1x16xf32>
    %22 = arith.negf %21 : vector<1x16xf32>
    %23 = math.exp %22 : vector<1x16xf32>
    %cst_14 = arith.constant 1.000000e+00 : f32
    %24 = vector.broadcast %cst_14 : f32 to vector<1x16xf32>
    %25 = arith.addf %24, %23 : vector<1x16xf32>
    %26 = arith.divf %24, %25 : vector<1x16xf32>
    %27 = vector.shape_cast %26 : vector<1x16xf32> to vector<1x16x1xf32>
    %28 = vector.broadcast %27 : vector<1x16x1xf32> to vector<1x16x256xf32>
    %29 = arith.mulf %0, %28 : vector<1x16x256xf32>
    %cst_15 = arith.constant dense<0.000000e+00> : vector<1x256xf32>
    %30 = vector.multi_reduction <add>, %29, %cst_15 [1] : vector<1x16x256xf32> to vector<1x256xf32>
    %cst_16 = arith.constant 6.250000e-02 : f32
    %31 = vector.broadcast %cst_16 : f32 to vector<1x256xf32>
    %32 = arith.mulf %30, %31 : vector<1x256xf32>
    %33 = tpu.iota {dimensions = array<i32: 1>} : vector<1x256xi32>
    %c16_i32 = arith.constant 16 : i32
    %c0_i32 = arith.constant 0 : i32
    %34 = arith.cmpi eq, %c16_i32, %c0_i32 : i32
    %c1_i32 = arith.constant 1 : i32
    %35 = arith.select %34, %c1_i32, %c16_i32 : i32
    %36 = vector.broadcast %35 : i32 to vector<1x256xi32>
    %37 = arith.remsi %33, %36 : vector<1x256xi32>
    %c0_i32_17 = arith.constant 0 : i32
    %38 = vector.broadcast %c0_i32_17 : i32 to vector<1x256xi32>
    %39 = arith.cmpi ne, %37, %38 : vector<1x256xi32>
    %c0_i32_18 = arith.constant 0 : i32
    %40 = vector.broadcast %c0_i32_18 : i32 to vector<1x256xi32>
    %41 = arith.cmpi slt, %37, %40 : vector<1x256xi32>
    %c0_i32_19 = arith.constant 0 : i32
    %42 = arith.cmpi slt, %35, %c0_i32_19 : i32
    %43 = vector.broadcast %42 : i1 to vector<1x256xi1>
    %44 = vector.broadcast %43 : vector<1x256xi1> to vector<1x256xi1>
    %45 = arith.xori %41, %44 : vector<1x256xi1>
    %46 = arith.andi %45, %39 : vector<1x256xi1>
    %47 = vector.broadcast %35 : i32 to vector<1x256xi32>
    %48 = arith.addi %37, %47 : vector<1x256xi32>
    %49 = arith.select %46, %48, %37 : vector<1x256xi1>, vector<1x256xi32>
    %c0_i32_20 = arith.constant 0 : i32
    %50 = vector.broadcast %c0_i32_20 : i32 to vector<1x256xi32>
    %51 = arith.cmpi ne, %49, %50 : vector<1x256xi32>
    %52 = arith.extui %51 : vector<1x256xi1> to vector<1x256xi32>
    %53 = arith.sitofp %52 : vector<1x256xi32> to vector<1x256xf32>
    %c15_i32 = arith.constant 15 : i32
    %54 = vector.broadcast %c15_i32 : i32 to vector<1x256xi32>
    %55 = arith.cmpi ne, %49, %54 : vector<1x256xi32>
    %56 = arith.extui %55 : vector<1x256xi1> to vector<1x256xi32>
    %57 = arith.sitofp %56 : vector<1x256xi32> to vector<1x256xf32>
    %cst_21 = arith.constant 0.000000e+00 : f32
    %58 = vector.broadcast %cst_21 : f32 to vector<1x17xf32>
    %59 = vector.extract_strided_slice %32 {offsets = [0, 0], sizes = [1, 239], strides = [1, 1]} : vector<1x256xf32> to vector<1x239xf32>
    %60 = tpu.concatenate %58, %59 in 1 : vector<1x17xf32>, vector<1x239xf32> -> vector<1x256xf32>
    %61 = arith.mulf %60, %53 : vector<1x256xf32>
    %cst_22 = arith.constant 0.000000e+00 : f32
    %62 = vector.broadcast %cst_22 : f32 to vector<1x16xf32>
    %63 = vector.extract_strided_slice %32 {offsets = [0, 0], sizes = [1, 240], strides = [1, 1]} : vector<1x256xf32> to vector<1x240xf32>
    %64 = tpu.concatenate %62, %63 in 1 : vector<1x16xf32>, vector<1x240xf32> -> vector<1x256xf32>
    %cst_23 = arith.constant 0.000000e+00 : f32
    %65 = vector.broadcast %cst_23 : f32 to vector<1x15xf32>
    %66 = vector.extract_strided_slice %32 {offsets = [0, 0], sizes = [1, 241], strides = [1, 1]} : vector<1x256xf32> to vector<1x241xf32>
    %67 = tpu.concatenate %65, %66 in 1 : vector<1x15xf32>, vector<1x241xf32> -> vector<1x256xf32>
    %68 = arith.mulf %67, %57 : vector<1x256xf32>
    %cst_24 = arith.constant 0.000000e+00 : f32
    %69 = vector.broadcast %cst_24 : f32 to vector<1x1xf32>
    %70 = vector.extract_strided_slice %32 {offsets = [0, 0], sizes = [1, 255], strides = [1, 1]} : vector<1x256xf32> to vector<1x255xf32>
    %71 = tpu.concatenate %69, %70 in 1 : vector<1x1xf32>, vector<1x255xf32> -> vector<1x256xf32>
    %72 = arith.mulf %71, %53 : vector<1x256xf32>
    %73 = vector.extract_strided_slice %32 {offsets = [0, 1], sizes = [1, 255], strides = [1, 1]} : vector<1x256xf32> to vector<1x255xf32>
    %cst_25 = arith.constant 0.000000e+00 : f32
    %74 = vector.broadcast %cst_25 : f32 to vector<1x1xf32>
    %75 = tpu.concatenate %73, %74 in 1 : vector<1x255xf32>, vector<1x1xf32> -> vector<1x256xf32>
    %76 = arith.mulf %75, %57 : vector<1x256xf32>
    %77 = vector.extract_strided_slice %32 {offsets = [0, 15], sizes = [1, 241], strides = [1, 1]} : vector<1x256xf32> to vector<1x241xf32>
    %cst_26 = arith.constant 0.000000e+00 : f32
    %78 = vector.broadcast %cst_26 : f32 to vector<1x15xf32>
    %79 = tpu.concatenate %77, %78 in 1 : vector<1x241xf32>, vector<1x15xf32> -> vector<1x256xf32>
    %80 = arith.mulf %79, %53 : vector<1x256xf32>
    %81 = vector.extract_strided_slice %32 {offsets = [0, 16], sizes = [1, 240], strides = [1, 1]} : vector<1x256xf32> to vector<1x240xf32>
    %cst_27 = arith.constant 0.000000e+00 : f32
    %82 = vector.broadcast %cst_27 : f32 to vector<1x16xf32>
    %83 = tpu.concatenate %81, %82 in 1 : vector<1x240xf32>, vector<1x16xf32> -> vector<1x256xf32>
    %84 = vector.extract_strided_slice %32 {offsets = [0, 17], sizes = [1, 239], strides = [1, 1]} : vector<1x256xf32> to vector<1x239xf32>
    %cst_28 = arith.constant 0.000000e+00 : f32
    %85 = vector.broadcast %cst_28 : f32 to vector<1x17xf32>
    %86 = tpu.concatenate %84, %85 in 1 : vector<1x239xf32>, vector<1x17xf32> -> vector<1x256xf32>
    %87 = arith.mulf %86, %57 : vector<1x256xf32>
    %c0_29 = arith.constant 0 : index
    %88 = memref.load %arg9[%c0_29] : memref<1xf32, #tpu.memory_space<smem>>
    %89 = vector.broadcast %88 : f32 to vector<1x256xf32>
    %c0_30 = arith.constant 0 : index
    %90 = memref.load %arg7[%c0_30] : memref<2xf32, #tpu.memory_space<smem>>
    %91 = vector.broadcast %90 : f32 to vector<1x256xf32>
    %c0_31 = arith.constant 0 : index
    %92 = memref.load %arg6[%c0_31] : memref<18xf32, #tpu.memory_space<smem>>
    %93 = vector.broadcast %92 : f32 to vector<1x256xf32>
    %94 = arith.mulf %93, %61 : vector<1x256xf32>
    %95 = arith.addf %91, %94 : vector<1x256xf32>
    %c1 = arith.constant 1 : index
    %96 = memref.load %arg6[%c1] : memref<18xf32, #tpu.memory_space<smem>>
    %97 = vector.broadcast %96 : f32 to vector<1x256xf32>
    %98 = arith.mulf %97, %64 : vector<1x256xf32>
    %99 = arith.addf %95, %98 : vector<1x256xf32>
    %c2 = arith.constant 2 : index
    %100 = memref.load %arg6[%c2] : memref<18xf32, #tpu.memory_space<smem>>
    %101 = vector.broadcast %100 : f32 to vector<1x256xf32>
    %102 = arith.mulf %101, %68 : vector<1x256xf32>
    %103 = arith.addf %99, %102 : vector<1x256xf32>
    %c3 = arith.constant 3 : index
    %104 = memref.load %arg6[%c3] : memref<18xf32, #tpu.memory_space<smem>>
    %105 = vector.broadcast %104 : f32 to vector<1x256xf32>
    %106 = arith.mulf %105, %72 : vector<1x256xf32>
    %107 = arith.addf %103, %106 : vector<1x256xf32>
    %c4 = arith.constant 4 : index
    %108 = memref.load %arg6[%c4] : memref<18xf32, #tpu.memory_space<smem>>
    %109 = vector.broadcast %108 : f32 to vector<1x256xf32>
    %110 = arith.mulf %109, %32 : vector<1x256xf32>
    %111 = arith.addf %107, %110 : vector<1x256xf32>
    %c5 = arith.constant 5 : index
    %112 = memref.load %arg6[%c5] : memref<18xf32, #tpu.memory_space<smem>>
    %113 = vector.broadcast %112 : f32 to vector<1x256xf32>
    %114 = arith.mulf %113, %76 : vector<1x256xf32>
    %115 = arith.addf %111, %114 : vector<1x256xf32>
    %c6 = arith.constant 6 : index
    %116 = memref.load %arg6[%c6] : memref<18xf32, #tpu.memory_space<smem>>
    %117 = vector.broadcast %116 : f32 to vector<1x256xf32>
    %118 = arith.mulf %117, %80 : vector<1x256xf32>
    %119 = arith.addf %115, %118 : vector<1x256xf32>
    %c7 = arith.constant 7 : index
    %120 = memref.load %arg6[%c7] : memref<18xf32, #tpu.memory_space<smem>>
    %121 = vector.broadcast %120 : f32 to vector<1x256xf32>
    %122 = arith.mulf %121, %83 : vector<1x256xf32>
    %123 = arith.addf %119, %122 : vector<1x256xf32>
    %c8 = arith.constant 8 : index
    %124 = memref.load %arg6[%c8] : memref<18xf32, #tpu.memory_space<smem>>
    %125 = vector.broadcast %124 : f32 to vector<1x256xf32>
    %126 = arith.mulf %125, %87 : vector<1x256xf32>
    %127 = arith.addf %123, %126 : vector<1x256xf32>
    %cst_32 = arith.constant 0.000000e+00 : f32
    %128 = vector.broadcast %cst_32 : f32 to vector<1x256xf32>
    %129 = arith.maximumf %127, %128 : vector<1x256xf32>
    %c0_33 = arith.constant 0 : index
    %130 = memref.load %arg8[%c0_33] : memref<18xf32, #tpu.memory_space<smem>>
    %cst_34 = arith.constant 0.000000e+00 : f32
    %131 = vector.broadcast %cst_34 : f32 to vector<1x17xf32>
    %132 = vector.extract_strided_slice %129 {offsets = [0, 0], sizes = [1, 239], strides = [1, 1]} : vector<1x256xf32> to vector<1x239xf32>
    %133 = tpu.concatenate %131, %132 in 1 : vector<1x17xf32>, vector<1x239xf32> -> vector<1x256xf32>
    %134 = arith.mulf %133, %53 : vector<1x256xf32>
    %135 = vector.broadcast %130 : f32 to vector<1x256xf32>
    %136 = arith.mulf %135, %134 : vector<1x256xf32>
    %137 = arith.addf %89, %136 : vector<1x256xf32>
    %c1_35 = arith.constant 1 : index
    %138 = memref.load %arg8[%c1_35] : memref<18xf32, #tpu.memory_space<smem>>
    %cst_36 = arith.constant 0.000000e+00 : f32
    %139 = vector.broadcast %cst_36 : f32 to vector<1x16xf32>
    %140 = vector.extract_strided_slice %129 {offsets = [0, 0], sizes = [1, 240], strides = [1, 1]} : vector<1x256xf32> to vector<1x240xf32>
    %141 = tpu.concatenate %139, %140 in 1 : vector<1x16xf32>, vector<1x240xf32> -> vector<1x256xf32>
    %142 = vector.broadcast %138 : f32 to vector<1x256xf32>
    %143 = arith.mulf %142, %141 : vector<1x256xf32>
    %144 = arith.addf %137, %143 : vector<1x256xf32>
    %c2_37 = arith.constant 2 : index
    %145 = memref.load %arg8[%c2_37] : memref<18xf32, #tpu.memory_space<smem>>
    %cst_38 = arith.constant 0.000000e+00 : f32
    %146 = vector.broadcast %cst_38 : f32 to vector<1x15xf32>
    %147 = vector.extract_strided_slice %129 {offsets = [0, 0], sizes = [1, 241], strides = [1, 1]} : vector<1x256xf32> to vector<1x241xf32>
    %148 = tpu.concatenate %146, %147 in 1 : vector<1x15xf32>, vector<1x241xf32> -> vector<1x256xf32>
    %149 = arith.mulf %148, %57 : vector<1x256xf32>
    %150 = vector.broadcast %145 : f32 to vector<1x256xf32>
    %151 = arith.mulf %150, %149 : vector<1x256xf32>
    %152 = arith.addf %144, %151 : vector<1x256xf32>
    %c3_39 = arith.constant 3 : index
    %153 = memref.load %arg8[%c3_39] : memref<18xf32, #tpu.memory_space<smem>>
    %cst_40 = arith.constant 0.000000e+00 : f32
    %154 = vector.broadcast %cst_40 : f32 to vector<1x1xf32>
    %155 = vector.extract_strided_slice %129 {offsets = [0, 0], sizes = [1, 255], strides = [1, 1]} : vector<1x256xf32> to vector<1x255xf32>
    %156 = tpu.concatenate %154, %155 in 1 : vector<1x1xf32>, vector<1x255xf32> -> vector<1x256xf32>
    %157 = arith.mulf %156, %53 : vector<1x256xf32>
    %158 = vector.broadcast %153 : f32 to vector<1x256xf32>
    %159 = arith.mulf %158, %157 : vector<1x256xf32>
    %160 = arith.addf %152, %159 : vector<1x256xf32>
    %c4_41 = arith.constant 4 : index
    %161 = memref.load %arg8[%c4_41] : memref<18xf32, #tpu.memory_space<smem>>
    %162 = vector.broadcast %161 : f32 to vector<1x256xf32>
    %163 = arith.mulf %162, %129 : vector<1x256xf32>
    %164 = arith.addf %160, %163 : vector<1x256xf32>
    %c5_42 = arith.constant 5 : index
    %165 = memref.load %arg8[%c5_42] : memref<18xf32, #tpu.memory_space<smem>>
    %166 = vector.extract_strided_slice %129 {offsets = [0, 1], sizes = [1, 255], strides = [1, 1]} : vector<1x256xf32> to vector<1x255xf32>
    %cst_43 = arith.constant 0.000000e+00 : f32
    %167 = vector.broadcast %cst_43 : f32 to vector<1x1xf32>
    %168 = tpu.concatenate %166, %167 in 1 : vector<1x255xf32>, vector<1x1xf32> -> vector<1x256xf32>
    %169 = arith.mulf %168, %57 : vector<1x256xf32>
    %170 = vector.broadcast %165 : f32 to vector<1x256xf32>
    %171 = arith.mulf %170, %169 : vector<1x256xf32>
    %172 = arith.addf %164, %171 : vector<1x256xf32>
    %c6_44 = arith.constant 6 : index
    %173 = memref.load %arg8[%c6_44] : memref<18xf32, #tpu.memory_space<smem>>
    %174 = vector.extract_strided_slice %129 {offsets = [0, 15], sizes = [1, 241], strides = [1, 1]} : vector<1x256xf32> to vector<1x241xf32>
    %cst_45 = arith.constant 0.000000e+00 : f32
    %175 = vector.broadcast %cst_45 : f32 to vector<1x15xf32>
    %176 = tpu.concatenate %174, %175 in 1 : vector<1x241xf32>, vector<1x15xf32> -> vector<1x256xf32>
    %177 = arith.mulf %176, %53 : vector<1x256xf32>
    %178 = vector.broadcast %173 : f32 to vector<1x256xf32>
    %179 = arith.mulf %178, %177 : vector<1x256xf32>
    %180 = arith.addf %172, %179 : vector<1x256xf32>
    %c7_46 = arith.constant 7 : index
    %181 = memref.load %arg8[%c7_46] : memref<18xf32, #tpu.memory_space<smem>>
    %182 = vector.extract_strided_slice %129 {offsets = [0, 16], sizes = [1, 240], strides = [1, 1]} : vector<1x256xf32> to vector<1x240xf32>
    %cst_47 = arith.constant 0.000000e+00 : f32
    %183 = vector.broadcast %cst_47 : f32 to vector<1x16xf32>
    %184 = tpu.concatenate %182, %183 in 1 : vector<1x240xf32>, vector<1x16xf32> -> vector<1x256xf32>
    %185 = vector.broadcast %181 : f32 to vector<1x256xf32>
    %186 = arith.mulf %185, %184 : vector<1x256xf32>
    %187 = arith.addf %180, %186 : vector<1x256xf32>
    %c8_48 = arith.constant 8 : index
    %188 = memref.load %arg8[%c8_48] : memref<18xf32, #tpu.memory_space<smem>>
    %189 = vector.extract_strided_slice %129 {offsets = [0, 17], sizes = [1, 239], strides = [1, 1]} : vector<1x256xf32> to vector<1x239xf32>
    %cst_49 = arith.constant 0.000000e+00 : f32
    %190 = vector.broadcast %cst_49 : f32 to vector<1x17xf32>
    %191 = tpu.concatenate %189, %190 in 1 : vector<1x239xf32>, vector<1x17xf32> -> vector<1x256xf32>
    %192 = arith.mulf %191, %57 : vector<1x256xf32>
    %193 = vector.broadcast %188 : f32 to vector<1x256xf32>
    %194 = arith.mulf %193, %192 : vector<1x256xf32>
    %195 = arith.addf %187, %194 : vector<1x256xf32>
    %c1_50 = arith.constant 1 : index
    %196 = memref.load %arg7[%c1_50] : memref<2xf32, #tpu.memory_space<smem>>
    %197 = vector.broadcast %196 : f32 to vector<1x256xf32>
    %c9 = arith.constant 9 : index
    %198 = memref.load %arg6[%c9] : memref<18xf32, #tpu.memory_space<smem>>
    %199 = vector.broadcast %198 : f32 to vector<1x256xf32>
    %200 = arith.mulf %199, %61 : vector<1x256xf32>
    %201 = arith.addf %197, %200 : vector<1x256xf32>
    %c10 = arith.constant 10 : index
    %202 = memref.load %arg6[%c10] : memref<18xf32, #tpu.memory_space<smem>>
    %203 = vector.broadcast %202 : f32 to vector<1x256xf32>
    %204 = arith.mulf %203, %64 : vector<1x256xf32>
    %205 = arith.addf %201, %204 : vector<1x256xf32>
    %c11 = arith.constant 11 : index
    %206 = memref.load %arg6[%c11] : memref<18xf32, #tpu.memory_space<smem>>
    %207 = vector.broadcast %206 : f32 to vector<1x256xf32>
    %208 = arith.mulf %207, %68 : vector<1x256xf32>
    %209 = arith.addf %205, %208 : vector<1x256xf32>
    %c12 = arith.constant 12 : index
    %210 = memref.load %arg6[%c12] : memref<18xf32, #tpu.memory_space<smem>>
    %211 = vector.broadcast %210 : f32 to vector<1x256xf32>
    %212 = arith.mulf %211, %72 : vector<1x256xf32>
    %213 = arith.addf %209, %212 : vector<1x256xf32>
    %c13 = arith.constant 13 : index
    %214 = memref.load %arg6[%c13] : memref<18xf32, #tpu.memory_space<smem>>
    %215 = vector.broadcast %214 : f32 to vector<1x256xf32>
    %216 = arith.mulf %215, %32 : vector<1x256xf32>
    %217 = arith.addf %213, %216 : vector<1x256xf32>
    %c14 = arith.constant 14 : index
    %218 = memref.load %arg6[%c14] : memref<18xf32, #tpu.memory_space<smem>>
    %219 = vector.broadcast %218 : f32 to vector<1x256xf32>
    %220 = arith.mulf %219, %76 : vector<1x256xf32>
    %221 = arith.addf %217, %220 : vector<1x256xf32>
    %c15 = arith.constant 15 : index
    %222 = memref.load %arg6[%c15] : memref<18xf32, #tpu.memory_space<smem>>
    %223 = vector.broadcast %222 : f32 to vector<1x256xf32>
    %224 = arith.mulf %223, %80 : vector<1x256xf32>
    %225 = arith.addf %221, %224 : vector<1x256xf32>
    %c16 = arith.constant 16 : index
    %226 = memref.load %arg6[%c16] : memref<18xf32, #tpu.memory_space<smem>>
    %227 = vector.broadcast %226 : f32 to vector<1x256xf32>
    %228 = arith.mulf %227, %83 : vector<1x256xf32>
    %229 = arith.addf %225, %228 : vector<1x256xf32>
    %c17 = arith.constant 17 : index
    %230 = memref.load %arg6[%c17] : memref<18xf32, #tpu.memory_space<smem>>
    %231 = vector.broadcast %230 : f32 to vector<1x256xf32>
    %232 = arith.mulf %231, %87 : vector<1x256xf32>
    %233 = arith.addf %229, %232 : vector<1x256xf32>
    %cst_51 = arith.constant 0.000000e+00 : f32
    %234 = vector.broadcast %cst_51 : f32 to vector<1x256xf32>
    %235 = arith.maximumf %233, %234 : vector<1x256xf32>
    %c9_52 = arith.constant 9 : index
    %236 = memref.load %arg8[%c9_52] : memref<18xf32, #tpu.memory_space<smem>>
    %cst_53 = arith.constant 0.000000e+00 : f32
    %237 = vector.broadcast %cst_53 : f32 to vector<1x17xf32>
    %238 = vector.extract_strided_slice %235 {offsets = [0, 0], sizes = [1, 239], strides = [1, 1]} : vector<1x256xf32> to vector<1x239xf32>
    %239 = tpu.concatenate %237, %238 in 1 : vector<1x17xf32>, vector<1x239xf32> -> vector<1x256xf32>
    %240 = arith.mulf %239, %53 : vector<1x256xf32>
    %241 = vector.broadcast %236 : f32 to vector<1x256xf32>
    %242 = arith.mulf %241, %240 : vector<1x256xf32>
    %243 = arith.addf %195, %242 : vector<1x256xf32>
    %c10_54 = arith.constant 10 : index
    %244 = memref.load %arg8[%c10_54] : memref<18xf32, #tpu.memory_space<smem>>
    %cst_55 = arith.constant 0.000000e+00 : f32
    %245 = vector.broadcast %cst_55 : f32 to vector<1x16xf32>
    %246 = vector.extract_strided_slice %235 {offsets = [0, 0], sizes = [1, 240], strides = [1, 1]} : vector<1x256xf32> to vector<1x240xf32>
    %247 = tpu.concatenate %245, %246 in 1 : vector<1x16xf32>, vector<1x240xf32> -> vector<1x256xf32>
    %248 = vector.broadcast %244 : f32 to vector<1x256xf32>
    %249 = arith.mulf %248, %247 : vector<1x256xf32>
    %250 = arith.addf %243, %249 : vector<1x256xf32>
    %c11_56 = arith.constant 11 : index
    %251 = memref.load %arg8[%c11_56] : memref<18xf32, #tpu.memory_space<smem>>
    %cst_57 = arith.constant 0.000000e+00 : f32
    %252 = vector.broadcast %cst_57 : f32 to vector<1x15xf32>
    %253 = vector.extract_strided_slice %235 {offsets = [0, 0], sizes = [1, 241], strides = [1, 1]} : vector<1x256xf32> to vector<1x241xf32>
    %254 = tpu.concatenate %252, %253 in 1 : vector<1x15xf32>, vector<1x241xf32> -> vector<1x256xf32>
    %255 = arith.mulf %254, %57 : vector<1x256xf32>
    %256 = vector.broadcast %251 : f32 to vector<1x256xf32>
    %257 = arith.mulf %256, %255 : vector<1x256xf32>
    %258 = arith.addf %250, %257 : vector<1x256xf32>
    %c12_58 = arith.constant 12 : index
    %259 = memref.load %arg8[%c12_58] : memref<18xf32, #tpu.memory_space<smem>>
    %cst_59 = arith.constant 0.000000e+00 : f32
    %260 = vector.broadcast %cst_59 : f32 to vector<1x1xf32>
    %261 = vector.extract_strided_slice %235 {offsets = [0, 0], sizes = [1, 255], strides = [1, 1]} : vector<1x256xf32> to vector<1x255xf32>
    %262 = tpu.concatenate %260, %261 in 1 : vector<1x1xf32>, vector<1x255xf32> -> vector<1x256xf32>
    %263 = arith.mulf %262, %53 : vector<1x256xf32>
    %264 = vector.broadcast %259 : f32 to vector<1x256xf32>
    %265 = arith.mulf %264, %263 : vector<1x256xf32>
    %266 = arith.addf %258, %265 : vector<1x256xf32>
    %c13_60 = arith.constant 13 : index
    %267 = memref.load %arg8[%c13_60] : memref<18xf32, #tpu.memory_space<smem>>
    %268 = vector.broadcast %267 : f32 to vector<1x256xf32>
    %269 = arith.mulf %268, %235 : vector<1x256xf32>
    %270 = arith.addf %266, %269 : vector<1x256xf32>
    %c14_61 = arith.constant 14 : index
    %271 = memref.load %arg8[%c14_61] : memref<18xf32, #tpu.memory_space<smem>>
    %272 = vector.extract_strided_slice %235 {offsets = [0, 1], sizes = [1, 255], strides = [1, 1]} : vector<1x256xf32> to vector<1x255xf32>
    %cst_62 = arith.constant 0.000000e+00 : f32
    %273 = vector.broadcast %cst_62 : f32 to vector<1x1xf32>
    %274 = tpu.concatenate %272, %273 in 1 : vector<1x255xf32>, vector<1x1xf32> -> vector<1x256xf32>
    %275 = arith.mulf %274, %57 : vector<1x256xf32>
    %276 = vector.broadcast %271 : f32 to vector<1x256xf32>
    %277 = arith.mulf %276, %275 : vector<1x256xf32>
    %278 = arith.addf %270, %277 : vector<1x256xf32>
    %c15_63 = arith.constant 15 : index
    %279 = memref.load %arg8[%c15_63] : memref<18xf32, #tpu.memory_space<smem>>
    %280 = vector.extract_strided_slice %235 {offsets = [0, 15], sizes = [1, 241], strides = [1, 1]} : vector<1x256xf32> to vector<1x241xf32>
    %cst_64 = arith.constant 0.000000e+00 : f32
    %281 = vector.broadcast %cst_64 : f32 to vector<1x15xf32>
    %282 = tpu.concatenate %280, %281 in 1 : vector<1x241xf32>, vector<1x15xf32> -> vector<1x256xf32>
    %283 = arith.mulf %282, %53 : vector<1x256xf32>
    %284 = vector.broadcast %279 : f32 to vector<1x256xf32>
    %285 = arith.mulf %284, %283 : vector<1x256xf32>
    %286 = arith.addf %278, %285 : vector<1x256xf32>
    %c16_65 = arith.constant 16 : index
    %287 = memref.load %arg8[%c16_65] : memref<18xf32, #tpu.memory_space<smem>>
    %288 = vector.extract_strided_slice %235 {offsets = [0, 16], sizes = [1, 240], strides = [1, 1]} : vector<1x256xf32> to vector<1x240xf32>
    %cst_66 = arith.constant 0.000000e+00 : f32
    %289 = vector.broadcast %cst_66 : f32 to vector<1x16xf32>
    %290 = tpu.concatenate %288, %289 in 1 : vector<1x240xf32>, vector<1x16xf32> -> vector<1x256xf32>
    %291 = vector.broadcast %287 : f32 to vector<1x256xf32>
    %292 = arith.mulf %291, %290 : vector<1x256xf32>
    %293 = arith.addf %286, %292 : vector<1x256xf32>
    %c17_67 = arith.constant 17 : index
    %294 = memref.load %arg8[%c17_67] : memref<18xf32, #tpu.memory_space<smem>>
    %295 = vector.extract_strided_slice %235 {offsets = [0, 17], sizes = [1, 239], strides = [1, 1]} : vector<1x256xf32> to vector<1x239xf32>
    %cst_68 = arith.constant 0.000000e+00 : f32
    %296 = vector.broadcast %cst_68 : f32 to vector<1x17xf32>
    %297 = tpu.concatenate %295, %296 in 1 : vector<1x239xf32>, vector<1x17xf32> -> vector<1x256xf32>
    %298 = arith.mulf %297, %57 : vector<1x256xf32>
    %299 = vector.broadcast %294 : f32 to vector<1x256xf32>
    %300 = arith.mulf %299, %298 : vector<1x256xf32>
    %301 = arith.addf %293, %300 : vector<1x256xf32>
    %302 = arith.negf %301 : vector<1x256xf32>
    %303 = math.exp %302 : vector<1x256xf32>
    %cst_69 = arith.constant 1.000000e+00 : f32
    %304 = vector.broadcast %cst_69 : f32 to vector<1x256xf32>
    %305 = arith.addf %304, %303 : vector<1x256xf32>
    %306 = arith.divf %304, %305 : vector<1x256xf32>
    %307 = vector.shape_cast %306 : vector<1x256xf32> to vector<1x1x256xf32>
    %308 = vector.broadcast %307 : vector<1x1x256xf32> to vector<1x16x256xf32>
    %309 = arith.mulf %29, %308 : vector<1x16x256xf32>
    %c0_70 = arith.constant 0 : index
    %c0_71 = arith.constant 0 : index
    %c0_72 = arith.constant 0 : index
    %310 = vector.load %arg10[%c0_70, %c0_71, %c0_72] : memref<1x16x256xf32, #tpu.memory_space<vmem>>, vector<1x16x256xf32>
    tpu.vector_store %arg10[%c0_70, %c0_71, %c0_72], %309 {strides = array<i32>} : memref<1x16x256xf32, #tpu.memory_space<vmem>>, vector<1x16x256xf32>,
    return
  }
  func.func @transform_0(%arg0: i32) -> (i32, i32, i32) {
    %c0_i32 = arith.constant 0 : i32
    %c0_i32_0 = arith.constant 0 : i32
    %c0_i32_1 = arith.constant 0 : i32
    return %arg0, %c0_i32, %c0_i32_0 : i32, i32, i32
  }
  func.func @transform_1(%arg0: i32) -> (i32, i32) {
    %c0_i32 = arith.constant 0 : i32
    %c0_i32_0 = arith.constant 0 : i32
    %c0_i32_1 = arith.constant 0 : i32
    return %c0_i32, %c0_i32_0 : i32, i32
  }
  func.func @transform_2(%arg0: i32) -> (i32, i32) {
    %c0_i32 = arith.constant 0 : i32
    %c0_i32_0 = arith.constant 0 : i32
    %c0_i32_1 = arith.constant 0 : i32
    return %c0_i32, %c0_i32_0 : i32, i32
  }
  func.func @transform_3(%arg0: i32) -> (i32, i32) {
    %c0_i32 = arith.constant 0 : i32
    %c0_i32_0 = arith.constant 0 : i32
    %c0_i32_1 = arith.constant 0 : i32
    return %c0_i32, %c0_i32_0 : i32, i32
  }
  func.func @transform_4(%arg0: i32) -> (i32, i32) {
    %c0_i32 = arith.constant 0 : i32
    %c0_i32_0 = arith.constant 0 : i32
    %c0_i32_1 = arith.constant 0 : i32
    return %c0_i32, %c0_i32_0 : i32, i32
  }
  func.func @transform_5(%arg0: i32) -> i32 {
    %c0_i32 = arith.constant 0 : i32
    %c0_i32_0 = arith.constant 0 : i32
    return %c0_i32 : i32
  }
  func.func @transform_6(%arg0: i32) -> i32 {
    %c0_i32 = arith.constant 0 : i32
    %c0_i32_0 = arith.constant 0 : i32
    return %c0_i32 : i32
  }
  func.func @transform_7(%arg0: i32) -> i32 {
    %c0_i32 = arith.constant 0 : i32
    %c0_i32_0 = arith.constant 0 : i32
    return %c0_i32 : i32
  }
  func.func @transform_8(%arg0: i32) -> i32 {
    %c0_i32 = arith.constant 0 : i32
    %c0_i32_0 = arith.constant 0 : i32
    return %c0_i32 : i32
  }
  func.func @transform_9(%arg0: i32) -> (i32, i32, i32) {
    %c0_i32 = arith.constant 0 : i32
    %c0_i32_0 = arith.constant 0 : i32
    %c0_i32_1 = arith.constant 0 : i32
    return %arg0, %c0_i32, %c0_i32_0 : i32, i32, i32
  }
}

</mosaic_0001>

<bundles_post_ra>
// kernel: tpu_custom_call.1
= control target key start
LH: loop header
LB: loop body
LE: loop exit
PB: predicated region body
PF: predicated region fallthrough
CT: control target
= control target key end

     0   :  { %s2576_s0 = inlined_call_operand.hbm [shape: f32[2,16,256], index: 0, kind: input, shape index: {}]   ;;  %s2577_s1 = inlined_call_operand.vmem [shape: f32[2,16], index: 1, kind: input, shape index: {}]   ;;  %s2578_s2 = inlined_call_operand.vmem [shape: f32[1,2], index: 2, kind: input, shape index: {}]   ;;  %s2579_s3 = inlined_call_operand.vmem [shape: f32[16,2], index: 3, kind: input, shape index: {}]   ;;  %s2580_s4 = inlined_call_operand.vmem [shape: f32[1,16], index: 4, kind: input, shape index: {}]   ;;  %s2581_s5 = inlined_call_operand.vmem [shape: f32[18], index: 5, kind: input, shape index: {}]   ;;  %s2582_s6 = inlined_call_operand.vmem [shape: f32[2], index: 6, kind: input, shape index: {}]   ;;  %s2583_s7 = inlined_call_operand.vmem [shape: f32[18], index: 7, kind: input, shape index: {}]   ;;  %s2584_s8 = inlined_call_operand.<no memory space> [shape: f32[1], index: 8, kind: input, shape index: {}]   ;;  %s2585_s9 = inlined_call_operand.hbm [shape: f32[2,16,256], index: 9, kind: output, shape index: {}]  }
   0x1   :  { %14 = sst [smem:[#allocation2]] %s2584_s8 }
   0x2   :  { %15 = vsyncpa [#allocation4], 0 }
   0x3   :  { %17 = vsyncpa [#allocation4 + $0x1], 0 }
   0x4   :  { %18 = vsyncpa [#allocation6], 0 }
   0x5   :  { %19 = vsyncpa [#allocation9], 0 }
   0x6   :  { %20 = vsyncpa [#allocation5], 0 }
   0x7   :  { %22 = vsyncpa [#allocation5 + $0x1], 0  ;;  %s1904_s11 = smov 0   ;;  %s1906_s12 = smov 0  }
   0x8   :  { %s1908_s13 = smov 0   ;;  %s1910_s14 = smov 0  }
   0x9 LB: > { %s1925_s8 = sadd.s32 4294967295, %s1831_s14   ;;  %s1507_s15 = sadd.s32 4294967294, %s1831_s14   ;;  %s1831_s14 = sphi %s1910_s14, %s2615_s14   ;;  %s1827_s13 = sphi %s1908_s13, %s2614_s13   ;;  %s1823_s12 = sphi %s1906_s12, %s2613_s12   ;;  %s1819_s11 = sphi %s1904_s11, %s2612_s11  }
   0xa   : > { %p48_p0 = scmp.ne.s32.totalorder %s1823_s12, %s1819_s11  ;;  %p2586_p1 = scmp.eq.s32.totalorder %s1925_s8, 0 }
   0xb   : > { %p246_p3 = scmp.eq.s32.totalorder %s1507_s15, 1  ;;  %p1508_p5 = scmp.ge.s32.totalorder %s1831_s14, 1 }
   0xc   : > { %p1934_p4 = por %p2586_p1, %p48_p0  ;;  %p253_p7 = scmp.lt.s32.totalorder %s1831_s14, 3 }
   0xd   : > { %p1939_p6 = por %p246_p3, %p48_p0  ;;  %s289_s20 = sshll.u32 %s2582_s6, 4  ;;  %s290_s20 = int_to_ptr.vmem [resolvable:$true] %s289_s20 }
   0xe   : > { %s2594_s16 = scalar_select %p1934_p4, 1, 0 }
   0xf   : > { %s2595_s17 = scalar_select %p1939_p6, 1, 0 }
  0x10   : > { %p1947_p8 = pnand %p1508_p5, %p253_p7  ;;  %s278_s24 = sshll.u32 %s2581_s5, 4  ;;  %s279_s24 = int_to_ptr.vmem [resolvable:$true] %s278_s24 }
  0x11   : > { %s300_s28 = sshll.u32 %s2583_s7, 4  ;;  %s1682_s29 = scalar_lea.vmem %s290_s20, 16  ;;  %s1966_s28 = int_to_ptr.vmem [resolvable:$true] %s300_s28 }
  0x12   : > { %s2596_s21 = scalar_select %p1947_p8, 1, 0 }
  0x13   : > { %p1590_p10 = pneg %p1947_p8  ;;  %p1683_p12 = scmp.ne.s32.totalorder %s290_s20, %s1682_s29 }
  0x14   : > { %p1690_p5 = scmp.lt.s32.totalorder %s290_s20, %s290_s20  ;;  %p1691_p7 = scmp.lt.s32.totalorder %s1682_s29, %s1682_s29 }
  0x15   : > { %p1959_p11 = pnand %p1590_p10, %p2586_p1 }
  0x16   : > { %p1692_p10 = por %p1691_p7, %p1690_p5 }
  0x17   : > { %p1684_p13 = pneg %p1959_p11 }
  0x19   : > { %p1685_p0 = pnand %p1684_p13, %p1683_p12 }
  0x1b   : > { %p1686_p3 = pneg %p1685_p0 }
  0x1d   : > { %p1693_p9 = pnand %p1692_p10, %p1686_p3 }
  0x1f   : > { %1696 = shalt.err (!%p1693_p9)
}
  0x20   : > { %s1833_s30 = smov [#allocation8]   ;;  %s1697_s10 = scalar_lea.vmem %s279_s24, 16 }
  0x21   : > { %1596 = dma.vmem_to_smem (!%p1959_p11), %s290_s20, 16, %s1833_s30, [#allocation9]  }
  0x22   : > { %p1698_p1 = scmp.ne.s32.totalorder %s279_s24, %s1697_s10  ;;  %p1705_p4 = scmp.lt.s32.totalorder %s279_s24, %s279_s24 }
  0x23   : > { %p1706_p8 = scmp.lt.s32.totalorder %s1697_s10, %s1697_s10 }
  0x24   : > { %p1700_p2 = pnand %p1698_p1, %p1684_p13 }
  0x25   : > { %p1707_p12 = por %p1706_p8, %p1705_p4 }
  0x26   : > { %p1701_p6 = pneg %p1700_p2 }
  0x28   : > { %p1708_p0 = pnand %p1707_p12, %p1701_p6 }
  0x2a   : > { %1711 = shalt.err (!%p1708_p0)
}
  0x2b   : > { %s1834_s15 = smov [#allocation7]   ;;  %s1712_s18 = scalar_lea.vmem %s1966_s28, 16 }
  0x2c   : > { %1593 = dma.vmem_to_smem (!%p1959_p11), %s279_s24, 16, %s1834_s15, [#allocation6]  }
  0x2d   : > { %p1713_p9 = scmp.ne.s32.totalorder %s1966_s28, %s1712_s18  ;;  %p1720_p2 = scmp.lt.s32.totalorder %s1966_s28, %s1966_s28 }
  0x2e   : > { %p1721_p5 = scmp.lt.s32.totalorder %s1712_s18, %s1712_s18 }
  0x2f   : > { %p1715_p3 = pnand %p1713_p9, %p1684_p13 }
  0x30   : > { %p1722_p4 = por %p1721_p5, %p1720_p2 }
  0x31   : > { %p1716_p1 = pneg %p1715_p3 }
  0x33   : > { %p1723_p6 = pnand %p1722_p4, %p1716_p1 }
  0x35   : > { %1726 = shalt.err (!%p1723_p6)
}
  0x36   : > { %s1835_s19 = smov [#allocation10]   ;;  %s1991_s20 = sadd.s32 1, %s1831_s14  }
  0x37   : > { %1599 = dma.vmem_to_smem (!%p1959_p11), %s1966_s28, 16, %s1835_s19, [#allocation9]  }
  0x38   : > { %s32_s22 = ssub.s32 %s1831_s14, %s1991_s20  ;;  %s35_s23 = sadd.s32 1, %s1827_s13 }
  0x39   : > { %p33_p8 = scmp.eq.s32.totalorder %s32_s22, 0  ;;  %p42_p13 = scmp.ne.s32.totalorder %s1827_s13, %s1823_s12 }
  0x3a   : > { %p43_p7 = scmp.eq.s32.totalorder %s1831_s14, 0  ;;  %p1611_p10 = scmp.lt.s32.totalorder %s1831_s14, 2 }
  0x3b   : > { %s2001_s24 = scalar_select %p33_p8, %s1827_s13, %s35_s23  }
  0x3c   : > { %p44_p12 = por %p43_p7, %p42_p13  ;;  %p2598_p0 = scmp.eq.s32.totalorder %s1925_s8, 1 }
  0x3d   : > { %s314_s26 = sand.u32 1, %s1827_s13   ;;  %s1572_s27 = sshll.u32 %s1831_s14, 9 }
  0x3e   : > { %p2005_p9 = por %p2598_p0, %p42_p13  ;;  %s1513_s28 = sshll.u32 %s314_s26, 5 }
  0x3f   : > { %s2014_s10 = scalar_lea.hbm %s2576_s0, %s1572_s27  ;;  %s318_s15 = scalar_lea.vmem [#allocation3], %s1513_s28 }
  0x40   : > { %s325_s18 = sshll.u32 %s318_s15, 4  ;;  %p2016_p11 = pnand %p1611_p10, %p44_p12  ;;  %s2020_s18 = int_to_ptr.vmem [resolvable:$true] %s325_s18 }
  0x41   : > { %s2022_s22 = scalar_lea.sflag [#allocation4], %s314_s26  ;;  %s1727_s23 = scalar_lea.hbm %s2014_s10, 512 }
  0x42   : > { %p1728_p3 = scmp.ne.s32.totalorder %s2014_s10, %s1727_s23  ;;  %p1729_p1 = pneg %p2016_p11 }
  0x43   : > { %s1732_s29 = scalar_lea.hbm %s2576_s0, 1024  ;;  %p1733_p4 = scmp.lt.u32.totalorder %s2014_s10, %s2576_s0 }
  0x44   : > { %p1730_p2 = pnand %p1729_p1, %p1728_p3  ;;  %p1734_p6 = scmp.lt.u32.totalorder %s1732_s29, %s1727_s23 }
  0x45   : > { %p1736_p13 = scmp.lt.u32.totalorder %s1727_s23, %s2014_s10 }
  0x46   : > { %p1731_p5 = pneg %p1730_p2  ;;  %p1735_p8 = por %p1734_p6, %p1733_p4 }
  0x48   : > { %p1737_p7 = por %p1736_p13, %p1735_p8 }
  0x4a   : > { %p1738_p10 = pnand %p1737_p7, %p1731_p5 }
  0x4c   : > { %1741 = shalt.err (!%p1738_p10)
}
  0x4d   : > { %s1742_s26 = scalar_lea.vmem %s2020_s18, 512  ;;  %s1836_s27 = smov [#allocation3]  }
  0x4e   : > { %p1743_p12 = scmp.ne.s32.totalorder %s2020_s18, %s1742_s26  ;;  %s1747_s28 = sshll.u32 %s1836_s27, 4  ;;  %s1748_s28 = int_to_ptr.vmem [resolvable:$false] %s1747_s28 }
  0x4f   : > { %s1749_s30 = scalar_lea.vmem %s1748_s28, 1024  ;;  %p1750_p2 = scmp.lt.s32.totalorder %s2020_s18, %s1748_s28 }
  0x50   : > { %p1745_p0 = pnand %p1743_p12, %p1729_p1  ;;  %p1751_p4 = scmp.lt.s32.totalorder %s1749_s30, %s1742_s26 }
  0x52   : > { %p1746_p3 = pneg %p1745_p0  ;;  %p1752_p6 = por %p1751_p4, %p1750_p2 }
  0x54   : > { %p1753_p8 = pnand %p1752_p6, %p1746_p3 }
  0x56   : > { %1756 = shalt.err (!%p1753_p8)
}
  0x57   : > { %s1837_s23 = smov 256   ;;  %s1838_s29 = smov 16  }
  0x58   : > { %1603 = dma.hbm_to_vmem [thread:$0]  (!%p2016_p11), %s2014_s10, 512, %s2020_s18, %s2022_s22, %s1837_s23, %s1837_s23, %s1838_s29  }
  0x59   : > { %p2601_p1 = scmp.ne.s32.totalorder %s2596_s21, 0 }
  0x5a   : > { %s2053_s15 = sand.u32 (!%p2601_p1), 1, %s1823_s12   ;;  %p2602_p5 = scmp.ne.s32.totalorder (!%p2601_p1), %s2594_s16, 0 }
  0x5b   : > { %337 = sbr.rel (%p2601_p1) target bundleno = 1411 (0x583), region = 56  ;;  %s2589_s26 = sshll.u32 (!%p2601_p1), %s2053_s15, 5 }
  0x5c   : > { %s340_s27 = scalar_lea.sflag (!%p2601_p1), [#allocation4], %s2053_s15  ;;  %s343_s28 = scalar_lea.vmem (!%p2601_p1), [#allocation3], %s2589_s26 }
  0x62   : > { %1802 = dma.done.wait (%p2602_p5), %s340_s27, 512  }
  0x63   : > { %1804 = vsyncadd (%p2602_p5), %s340_s27, 4294966784  ;;  %p2603_p11 = scmp.eq.s32.totalorder %s1925_s8, 0 }
  0x65   : > { %1806 = dma.done.wait (%p2603_p11), [#allocation6], 16   ;;  %p2604_p13 = pmov %p2603_p11 }
  0x66   : > { %p2605_p7 = pmov %p2603_p11 }
  0x67   : > { %1808 = vsyncadd (%p2604_p13), [#allocation6], 4294967280 }
  0x68   : > { %1810 = dma.done.wait (%p2605_p7), [#allocation9], 32   ;;  %p2606_p10 = pmov %p2605_p7 }
  0x6a   : > { %1812 = vsyncadd (%p2606_p10), [#allocation9], 4294967264 }
  0x6b   : > { %360 = sfence }
  0x6c   : > { %v2071_v0 = vld [vmem:[%s343_s28] sm:$0xff]  ;;  %v2073_v1 = vld [vmem:[%s343_s28 + $0x8] sm:$0xff]  ;;  %v2075_v2 = vld [vmem:[%s343_s28 + $0x10] sm:$0xff]  ;;  %v405_v3 = vlaneseq  ;;  %v1839_v13 = vmov 0   ;;  %vm462_vm0 = vcmask 130112   ;;  %vm473_vm1 = vcmask 1041409  }
  0x6d   : > { %v395_v4 = vadd.f32 %v2073_v1, %v2071_v0  ;;  %v2079_v5 = vld [vmem:[%s343_s28 + $0x18] sm:$0xff]  ;;  %v403_v8 = vld [vmem:[%s2577_s1] sm:$0x3]  ;;  %1664 = vset.pattern.permute.xlu1 %v1839_v13  ;;  %1665 = vset.pattern.permute.xlu0 %v1839_v13  ;;  %v493_v27 = vld [vmem:[%s2579_s3 + $0x8] sm:$0xff]  ;;  %vm476_vm2 = vcmask 123904   ;;  %vm769_vm3 = vcmask 1042434  }
  0x6e   : > { %v2082_v6 = vshrl.u32 %v405_v3, 7  ;;  %v398_v7 = vadd.f32 %v2079_v5, %v2075_v2  ;;  %v1522_v14 = vld [vmem:[%s2578_s2] ss:$0 sm:$0xff]  ;;  %v2112_v51 = vand.u32 127, %v405_v3  ;;  %vm771_vm4 = vcmask 1043459   ;;  %s1840_s28 = smov 17  }
  0x6f   : > { %396 = vadd.xlane.f32.xlu0 %v395_v4  ;;  %v492_v18 = vld [vmem:[%s2579_s3] sm:$0xff]  ;;  %vm773_vm5 = vcmask 1044484   ;;  %vm775_vm6 = vcmask 1045509   ;;  %vm777_vm7 = vcmask 1046534   ;;  %vm779_vm8 = vcmask 1047559   ;;  %s1841_s16 = smov 16  }
  0x70   : > { %v2090_v9 = vsub.s32 0, %v2082_v6  ;;  %v418_v11 = vsub.s32 1, %v2082_v6  ;;  %v526_v31 = vsub.s32 4, %v2082_v6  ;;  %v540_v35 = vsub.s32 6, %v2082_v6  ;;  %s1842_s21 = smov 15   ;;  %s1843_s10 = smov 1  }
  0x71   : > { %v512_v36 = vsub.s32 2, %v2082_v6  ;;  %v519_v40 = vsub.s32 3, %v2082_v6  ;;  %v533_v44 = vsub.s32 5, %v2082_v6  ;;  %v547_v48 = vsub.s32 7, %v2082_v6  ;;  %s1844_s18 = smov 127   ;;  %s1845_s19 = smov 113  }
  0x72   : > { %v408_v10 = vrot.slane %v403_v8, %v2090_v9  ;;  %v419_v12 = vrot.slane %v403_v8, %v418_v11  ;;  %v499_v20 = vrot.slane %v492_v18, %v2090_v9  ;;  %v506_v26 = vrot.slane %v492_v18, %v418_v11  ;;  %s2592_s22 = smov 112   ;;  %s2590_s30 = smov 111  }
  0x73   : > { %399 = vadd.xlane.f32.xlu0 %v398_v7  ;;  %v555_v29 = vrot.slane %v493_v27, %v2090_v9  ;;  %v562_v33 = vrot.slane %v493_v27, %v418_v11  ;;  %v527_v34 = vrot.slane %v492_v18, %v526_v31  ;;  %v513_v37 = vrot.slane %v492_v18, %v512_v36  ;;  %s983_s23 = sld [smem:[#allocation7]]  ;;  %s2214_s27 = sld [smem:[#allocation7 + $0x1]] }
  0x74   : > { %410 = vbcast.lane.b32.xlu1 %v408_v10, 256  ;;  %v597_v38 = vrot.slane %v493_v27, %v540_v35  ;;  %v569_v39 = vrot.slane %v493_v27, %v512_v36  ;;  %v520_v41 = vrot.slane %v492_v18, %v519_v40  ;;  %v576_v42 = vrot.slane %v493_v27, %v519_v40  ;;  %s2212_s29 = sld [smem:[#allocation8]]  ;;  %s2216_s26 = sld [smem:[#allocation7 + $0x2]] }
  0x75   : > { %v583_v43 = vrot.slane %v493_v27, %v526_v31  ;;  %v534_v45 = vrot.slane %v492_v18, %v533_v44  ;;  %v590_v46 = vrot.slane %v493_v27, %v533_v44  ;;  %v541_v47 = vrot.slane %v492_v18, %v540_v35 }
  0x76   : > { %v548_v49 = vrot.slane %v492_v18, %v547_v48  ;;  %v457_v52 = vadd.s32 4294967288, %v2112_v51  ;;  %v2118_v56 = vsub.s32 %v2112_v51, %v2082_v6  ;;  %v604_v7 = vrot.slane %v493_v27, %v547_v48 }
  0x77   : > { %vm790_vm9 = vcmask 15360   ;;  %vm899_vm12 = vcmask 138240   ;;  %vm910_vm15 = vcmask 130048  }
  0x78   : > { %414 = vbcast.lane.b32.xlu1 %v408_v10, 264  ;;  %v460_v54 = vsub.s32 %v457_v52, %v2082_v6 }
  0x7c   : > { %425 = vbcast.lane.b32.xlu1 %v419_v12, 264 }
  0x89   : > { %421 = vbcast.lane.b32.xlu0 %v419_v12, 256 }
  0x8d   : > { %487 = vbcast.lane.b32.xlu0 %v1522_v14, 256 }
  0x91   : > { %501 = vbcast.lane.b32.xlu0 %v499_v20, 256 }
  0x95   : > { %508 = vbcast.lane.b32.xlu0 %v506_v26, 256 }
  0x99   : > { %557 = vbcast.lane.b32.xlu0 %v555_v29, 256 }
  0x9d   : > { %564 = vbcast.lane.b32.xlu0 %v562_v33, 256 }
  0xa1   : > { %515 = vbcast.lane.b32.xlu0 %v513_v37, 256 }
  0xa5   : > { %571 = vbcast.lane.b32.xlu0 %v569_v39, 256 }
  0xa9   : > { %522 = vbcast.lane.b32.xlu0 %v520_v41, 256 }
  0xad   : > { %578 = vbcast.lane.b32.xlu0 %v576_v42, 256 }
  0xb1   : > { %585 = vbcast.lane.b32.xlu0 %v583_v43, 256 }
  0xb5   : > { %536 = vbcast.lane.b32.xlu0 %v534_v45, 256 }
  0xb9   : > { %592 = vbcast.lane.b32.xlu0 %v590_v46, 256 }
  0xbd   : > { %543 = vbcast.lane.b32.xlu0 %v541_v47, 256 }
  0xc1   : > { %550 = vbcast.lane.b32.xlu0 %v548_v49, 256 }
  0xe6   : > { %v411_v15 = vpop.permute.xlu1 %410 }
  0xea   : > { %v415_v23 = vpop.permute.xlu1 %414 }
  0xee   : > { %v426_v30 = vpop.permute.xlu1 %425 }
  0xfc   : > { %v397_v16 = vpop.xlane.xlu0 %396 }
  0xfd   : > { %v401_v17 = vmul.f32 0.00390625, %v397_v16 }
  0xff   : > { %v431_v19 = vmul.f32 %v411_v15, %v401_v17 }
 0x100   : > { %v400_v21 = vpop.xlane.xlu0 %399 }
 0x101   : > { %v402_v22 = vmul.f32 0.00390625, %v400_v21  ;;  %440 = vperm.xlu1 %1664, %v431_v19  }
 0x103   : > { %v432_v24 = vmul.f32 %v415_v23, %v402_v22  ;;  %v434_v32 = vmul.f32 %v426_v30, %v402_v22 }
 0x104   : > { %v422_v25 = vpop.permute.xlu0 %421 }
 0x105   : > { %443 = vperm.xlu1 %1664, %v432_v24   ;;  %v433_v28 = vmul.f32 %v422_v25, %v401_v17 }
 0x108   : > { %v488_v6 = vpop.permute.xlu0 %487 }
 0x109   : > { %446 = vperm.xlu1 %1664, %v433_v28  }
 0x10c   : > { %v502_v8 = vpop.permute.xlu0 %501 }
 0x10d   : > { %449 = vperm.xlu1 %1664, %v434_v32  }
 0x110   : > { %v509_v10 = vpop.permute.xlu0 %508 }
 0x111   : > { %529 = vbcast.lane.b32.xlu1 %v527_v34, 256 }
 0x114   : > { %v558_v11 = vpop.permute.xlu0 %557 }
 0x115   : > { %599 = vbcast.lane.b32.xlu1 %v597_v38, 256 }
 0x118   : > { %v565_v12 = vpop.permute.xlu0 %564 }
 0x11c   : > { %v516_v13 = vpop.permute.xlu0 %515 }
 0x120   : > { %v572_v14 = vpop.permute.xlu0 %571 }
 0x124   : > { %v523_v16 = vpop.permute.xlu0 %522 }
 0x128   : > { %v579_v19 = vpop.permute.xlu0 %578 }
 0x12c   : > { %v586_v24 = vpop.permute.xlu0 %585 }
 0x130   : > { %v537_v27 = vpop.permute.xlu0 %536 }
 0x134   : > { %v593_v32 = vpop.permute.xlu0 %592 }
 0x138   : > { %v544_v35 = vpop.permute.xlu0 %543 }
 0x13c   : > { %v551_v41 = vpop.permute.xlu0 %550 }
 0x180   : > { %v441_v50 = vpop.permute.xlu1 %440 }
 0x181   : > { %v456_v59 = vrot.slane %v441_v50, %v2118_v56 }
 0x184   : > { %v444_v53 = vpop.permute.xlu1 %443 }
 0x185   : > { %v461_v57 = vrot.slane %v444_v53, %v460_v54 }
 0x187   : > { %v463_v62 = vsel %vm462_vm0, %v461_v57, %v456_v59 }
 0x188   : > { %v447_v55 = vpop.permute.xlu1 %446 }
 0x189   : > { %v467_v60 = vrot.slane %v447_v55, %v2118_v56 }
 0x18c   : > { %v450_v58 = vpop.permute.xlu1 %449 }
 0x18d   : > { %v471_v61 = vrot.slane %v450_v58, %v460_v54 }
 0x18f   : > { %v472_v63 = vsel %vm462_vm0, %v471_v61, %v467_v60  ;;  %vm919_vm0 = vcmask 121856  }
 0x190   : > { %v474_v3 = vsel %vm473_vm1, %v472_v63, %v463_v62  ;;  %v530_v15 = vpop.permute.xlu1 %529 }
 0x191   : > { %v477_v4 = vsel %vm476_vm2, %v474_v3, 0.0  ;;  %vm941_vm2 = vcmask 1039360  }
 0x192   : > { %478 = vadd.xlane.f32.xlu1 %v477_v4 }
 0x194   : > { %v600_v17 = vpop.permute.xlu1 %599 }
 0x1a3   : > { %606 = vbcast.lane.b32.xlu1 %v604_v7, 256 }
 0x21f   : > { %v479_v18 = vpop.xlane.xlu1 %478 }
 0x220   : > { %v490_v20 = vadd.f32 %v488_v6, %v479_v18 }
 0x222   : > { %v491_v21 = vmax.f32 %v490_v20, 0.0 }
 0x223   : > { %v607_v40 = vpop.permute.xlu1 %606 }
 0x224   : > { %v624_v22 = vmul.f32 %v502_v8, %v491_v21  ;;  %v625_v23 = vmul.f32 %v509_v10, %v491_v21  ;;  %v633_v25 = vmul.f32 %v565_v12, %v491_v21  ;;  %v632_v26 = vmul.f32 %v558_v11, %v491_v21 }
 0x225   : > { %v634_v28 = vmul.f32 %v572_v14, %v491_v21  ;;  %v626_v29 = vmul.f32 %v516_v13, %v491_v21  ;;  %v635_v30 = vmul.f32 %v579_v19, %v491_v21  ;;  %v627_v31 = vmul.f32 %v523_v16, %v491_v21 }
 0x226   : > { %657 = vperm.xlu0 %1665, %v624_v22   ;;  %660 = vperm.xlu1 %1664, %v625_v23   ;;  %v636_v33 = vmul.f32 %v586_v24, %v491_v21  ;;  %v628_v34 = vmul.f32 %v530_v15, %v491_v21  ;;  %v637_v36 = vmul.f32 %v593_v32, %v491_v21 }
 0x227   : > { %v629_v37 = vmul.f32 %v537_v27, %v491_v21  ;;  %v638_v38 = vmul.f32 %v600_v17, %v491_v21  ;;  %v630_v39 = vmul.f32 %v544_v35, %v491_v21  ;;  %v639_v42 = vmul.f32 %v607_v40, %v491_v21  ;;  %v1523_v35 = vld [vmem:[%s2580_s4] ss:$0 sm:$0xff] }
 0x228   : > { %v631_v43 = vmul.f32 %v551_v41, %v491_v21 }
 0x22a   : > { %684 = vperm.xlu0 %1665, %v633_v25   ;;  %681 = vperm.xlu1 %1664, %v632_v26  }
 0x22e   : > { %687 = vperm.xlu0 %1665, %v634_v28   ;;  %663 = vperm.xlu1 %1664, %v626_v29  }
 0x232   : > { %690 = vperm.xlu0 %1665, %v635_v30   ;;  %666 = vperm.xlu1 %1664, %v627_v31  }
 0x236   : > { %693 = vperm.xlu0 %1665, %v636_v33   ;;  %669 = vperm.xlu1 %1664, %v628_v34  }
 0x23a   : > { %696 = vperm.xlu0 %1665, %v637_v36   ;;  %672 = vperm.xlu1 %1664, %v629_v37  }
 0x23e   : > { %699 = vperm.xlu0 %1665, %v638_v38   ;;  %675 = vperm.xlu1 %1664, %v630_v39  }
 0x242   : > { %702 = vperm.xlu0 %1665, %v639_v42   ;;  %678 = vperm.xlu1 %1664, %v631_v43  }
 0x2a5   : > { %v658_v44 = vpop.permute.xlu0 %657  ;;  %v661_v45 = vpop.permute.xlu1 %660 }
 0x2a6   : > { %v711_v60 = vrot.slane %v661_v45, %v2118_v56  ;;  %v707_v61 = vrot.slane %v658_v44, %v2118_v56 }
 0x2a8   : > { %v768_v13 = vsel %vm473_vm1, %v711_v60, %v707_v61 }
 0x2a9   : > { %v685_v46 = vpop.permute.xlu0 %684  ;;  %v682_v47 = vpop.permute.xlu1 %681 }
 0x2aa   : > { %v739_v57 = vrot.slane %v682_v47, %v2118_v56  ;;  %v743_v58 = vrot.slane %v685_v46, %v2118_v56 }
 0x2ac   : > { %v781_v8 = vsel %vm473_vm1, %v743_v58, %v739_v57  ;;  %vm930_vm1 = vcmask 7168  }
 0x2ad   : > { %v688_v48 = vpop.permute.xlu0 %687  ;;  %v664_v49 = vpop.permute.xlu1 %663 }
 0x2ae   : > { %v747_v62 = vrot.slane %v688_v48, %v2118_v56  ;;  %v715_v63 = vrot.slane %v664_v49, %v2118_v56 }
 0x2b0   : > { %v782_v14 = vsel %vm769_vm3, %v747_v62, %v781_v8  ;;  %v770_v17 = vsel %vm769_vm3, %v715_v63, %v768_v13  ;;  %vm952_vm3 = vcmask 924672  }
 0x2b1   : > { %v691_v50 = vpop.permute.xlu0 %690  ;;  %v667_v52 = vpop.permute.xlu1 %666 }
 0x2b2   : > { %v751_v3 = vrot.slane %v691_v50, %v2118_v56  ;;  %v719_v4 = vrot.slane %v667_v52, %v2118_v56 }
 0x2b4   : > { %v783_v18 = vsel %vm771_vm4, %v751_v3, %v782_v14  ;;  %v772_v20 = vsel %vm771_vm4, %v719_v4, %v770_v17  ;;  %v1848_v14 = vmov 0.0   ;;  %vm963_vm4 = vcmask 916480  }
 0x2b5   : > { %v694_v53 = vpop.permute.xlu0 %693  ;;  %v670_v54 = vpop.permute.xlu1 %669 }
 0x2b6   : > { %v755_v7 = vrot.slane %v694_v53, %v2118_v56  ;;  %v723_v10 = vrot.slane %v670_v54, %v2118_v56 }
 0x2b8   : > { %v784_v21 = vsel %vm773_vm5, %v755_v7, %v783_v18  ;;  %v774_v23 = vsel %vm773_vm5, %v723_v10, %v772_v20  ;;  %v856_v10 = vadd.s32 128, %v2112_v51  ;;  %vm972_vm5 = vcmask 908288  }
 0x2b9   : > { %v697_v55 = vpop.permute.xlu0 %696  ;;  %v673_v59 = vpop.permute.xlu1 %672 }
 0x2ba   : > { %v759_v11 = vrot.slane %v697_v55, %v2118_v56  ;;  %v727_v15 = vrot.slane %v673_v59, %v2118_v56 }
 0x2bc   : > { %v785_v24 = vsel %vm775_vm6, %v759_v11, %v784_v21  ;;  %v776_v27 = vsel %vm775_vm6, %v727_v15, %v774_v23  ;;  %v861_v11 = vand.u32 15, %v2112_v51  ;;  %v984_v23 = vstv %s983_s23  ;;  %s2249_s23 = sld [smem:[#allocation7 + $0x4]] }
 0x2bd   : > { %v700_v6 = vpop.permute.xlu0 %699  ;;  %v676_v12 = vpop.permute.xlu1 %675 }
 0x2be   : > { %v763_v16 = vrot.slane %v700_v6, %v2118_v56  ;;  %v731_v19 = vrot.slane %v676_v12, %v2118_v56  ;;  %v868_v12 = vand.u32 15, %v856_v10  ;;  %vm881_vm10 = vcmp.ne.s32.totalorder %v861_v11, 0 }
 0x2bf   : > { %v2206_v15 = vsel %vm881_vm10, 1.0, %v1848_v14  ;;  %vm887_vm13 = vcmp.ne.s32.totalorder %v861_v11, 15 }
 0x2c0   : > { %v786_v29 = vsel %vm777_vm7, %v763_v16, %v785_v24  ;;  %v778_v30 = vsel %vm777_vm7, %v731_v19, %v776_v27  ;;  %vm882_vm11 = vcmp.ne.s32.totalorder %v868_v12, 0  ;;  %vm888_vm14 = vcmp.ne.s32.totalorder %v868_v12, 15 }
 0x2c1   : > { %v703_v22 = vpop.permute.xlu0 %702  ;;  %v679_v25 = vpop.permute.xlu1 %678  ;;  %v2208_v17 = vsel %vm882_vm11, 1.0, %v1848_v14  ;;  %v2228_v27 = vsel %vm887_vm13, 1.0, %v1848_v14 }
 0x2c2   : > { %v767_v26 = vrot.slane %v703_v22, %v2118_v56  ;;  %v735_v28 = vrot.slane %v679_v25, %v2118_v56 }
 0x2c4   : > { %v787_v31 = vsel %vm779_vm8, %v767_v26, %v786_v29  ;;  %v780_v32 = vsel %vm779_vm8, %v735_v28, %v778_v30  ;;  %v2230_v28 = vsel %vm888_vm14, 1.0, %v1848_v14  ;;  %v982_v30 = vstv %s2212_s29  ;;  %s2260_s29 = sld [smem:[#allocation7 + $0x6]] }
 0x2c5   : > { %v794_v33 = vsel %vm790_vm9, %v787_v31, 0.0  ;;  %v791_v34 = vsel %vm790_vm9, %v780_v32, 0.0  ;;  %v990_v31 = vstv %s2214_s27  ;;  %s2287_s27 = sld [smem:[#allocation7 + $0x8]] }
 0x2c6   : > { %795 = vadd.xlane.f32.xlu0 %v794_v33  ;;  %792 = vadd.xlane.f32.xlu1 %v791_v34 }
 0x2d7   : > { %808 = vbcast.lane.b32.xlu1 %v1523_v35, 264 }
 0x2dc   : > { %804 = vbcast.lane.b32.xlu0 %v1523_v35, 256 }
 0x353   : > { %v796_v36 = vpop.xlane.xlu0 %795  ;;  %v793_v37 = vpop.xlane.xlu1 %792 }
 0x357   : > { %v805_v38 = vpop.permute.xlu0 %804  ;;  %v809_v39 = vpop.permute.xlu1 %808 }
 0x358   : > { %v812_v40 = vadd.f32 %v805_v38, %v793_v37  ;;  %v813_v56 = vadd.f32 %v809_v39, %v796_v36  ;;  %v996_v36 = vstv %s2216_s26  ;;  %s2253_s26 = sld [smem:[#allocation7 + $0x5]] }
 0x35a   : > { %v1524_v41 = vmul.f32 -1.442695, %v812_v40  ;;  %v1525_v42 = vmul.f32 -1.442695, %v813_v56 }
 0x35c   : > { %1666 = vpow2.f32 %v1524_v41 }
 0x35d   : > { %1668 = vpow2.f32 %v1525_v42 }
 0x366   : > { %v1667_v43 = vpop.eup %1666 }
 0x367   : > { %v1669_v44 = vpop.eup %1668  ;;  %v820_v45 = vadd.f32 1.0, %v1667_v43 }
 0x368   : > { %v821_v46 = vadd.f32 1.0, %v1669_v44 }
 0x369   : > { %1670 = vrcp.f32 %v820_v45 }
 0x36a   : > { %1672 = vrcp.f32 %v821_v46 }
 0x373   : > { %v1671_v47 = vpop.eup %1670 }
 0x374   : > { %v1673_v48 = vpop.eup %1672  ;;  %828 = vperm.xlu1 %1664, %v1671_v47  }
 0x375   : > { %833 = vperm.xlu0 %1665, %v1673_v48  }
 0x3f3   : > { %v829_v49 = vpop.permute.xlu1 %828 }
 0x3f4   : > { %v2153_v50 = vmul.f32 %v829_v49, %v2071_v0  ;;  %v2156_v52 = vmul.f32 %v829_v49, %v2073_v1  ;;  %v834_v53 = vpop.permute.xlu0 %833 }
 0x3f5   : > { %v2159_v54 = vmul.f32 %v834_v53, %v2075_v2  ;;  %v2162_v55 = vmul.f32 %v834_v53, %v2079_v5 }
 0x3f7   : > { %v840_v57 = vadd.f32 %v2159_v54, %v2153_v50  ;;  %v847_v58 = vadd.f32 %v2162_v55, %v2156_v52 }
 0x3f9   : > { %v841_v59 = vrot.slane %v840_v57, 4  ;;  %v848_v60 = vrot.slane %v847_v58, 4 }
 0x3fb   : > { %v842_v0 = vadd.f32 %v841_v59, %v840_v57  ;;  %v849_v61 = vadd.f32 %v848_v60, %v847_v58 }
 0x3fd   : > { %v843_v62 = vrot.slane %v842_v0, 2  ;;  %v850_v1 = vrot.slane %v849_v61, 2 }
 0x3ff   : > { %v844_v63 = vadd.f32 %v843_v62, %v842_v0  ;;  %v851_v3 = vadd.f32 %v850_v1, %v849_v61 }
 0x401   : > { %v845_v4 = vrot.slane %v844_v63, 1  ;;  %v852_v2 = vrot.slane %v851_v3, 1 }
 0x403   : > { %v846_v7 = vadd.f32 %v845_v4, %v844_v63  ;;  %v853_v6 = vadd.f32 %v852_v2, %v851_v3  ;;  %v1008_v4 = vstv %s2249_s23  ;;  %s1547_s23 = sld [smem:[#allocation7 + $0x9]] }
 0x405   : > { %v2168_v5 = vmul.f32 0.0625, %v846_v7  ;;  %v2170_v8 = vmul.f32 0.0625, %v853_v6 }
 0x407   : > { %897 = vrot.lane.b32.xlu0 %v2170_v8, %s1840_s28  ;;  %895 = vrot.lane.b32.xlu1 %v2168_v5, %s1840_s28  ;;  %v1010_v14 = vmul.f32 %v1008_v4, %v2170_v8 }
 0x40b   : > { %908 = vrot.lane.b32.xlu0 %v2170_v8, %s1841_s16  ;;  %906 = vrot.lane.b32.xlu1 %v2168_v5, %s1841_s16 }
 0x40f   : > { %917 = vrot.lane.b32.xlu0 %v2170_v8, %s1842_s21  ;;  %915 = vrot.lane.b32.xlu1 %v2168_v5, %s1842_s21 }
 0x413   : > { %928 = vrot.lane.b32.xlu0 %v2170_v8, %s1843_s10  ;;  %926 = vrot.lane.b32.xlu1 %v2168_v5, %s1843_s10 }
 0x417   : > { %939 = vrot.lane.b32.xlu0 %v2170_v8, %s1844_s18  ;;  %937 = vrot.lane.b32.xlu1 %v2168_v5, %s1844_s18 }
 0x41b   : > { %950 = vrot.lane.b32.xlu0 %v2170_v8, %s1845_s19  ;;  %948 = vrot.lane.b32.xlu1 %v2168_v5, %s1845_s19 }
 0x41f   : > { %961 = vrot.lane.b32.xlu0 %v2170_v8, %s2592_s22  ;;  %959 = vrot.lane.b32.xlu1 %v2168_v5, %s2592_s22  ;;  %s1550_s22 = sld [smem:[#allocation7 + $0xc]] }
 0x423   : > { %970 = vrot.lane.b32.xlu0 %v2170_v8, %s2590_s30  ;;  %968 = vrot.lane.b32.xlu1 %v2168_v5, %s2590_s30  ;;  %s2224_s30 = sld [smem:[#allocation7 + $0x3]] }
 0x429   : > { %v1002_v48 = vstv %s2224_s30  ;;  %s2272_s30 = sld [smem:[#allocation7 + $0x7]] }
 0x479   : > { %v898_v13 = vpop.permute.xlu0 %897  ;;  %v896_v16 = vpop.permute.xlu1 %895 }
 0x47a   : > { %v900_v18 = vsel %vm899_vm12, %v896_v16, %v898_v13  ;;  %v903_v19 = vsel %vm899_vm12, 0.0, %v896_v16  ;;  %v1014_v13 = vstv %s2253_s26  ;;  %v1009_v16 = vmul.f32 %v1008_v4, %v2168_v5  ;;  %s1546_s26 = sld [smem:[#allocation8 + $0x1]] }
 0x47b   : > { %v2219_v51 = vmul.f32 %v2206_v15, %v903_v19  ;;  %v2222_v20 = vmul.f32 %v2208_v17, %v900_v18  ;;  %v1020_v18 = vstv %s2260_s29  ;;  %s1548_s29 = sld [smem:[#allocation7 + $0xa]] }
 0x47d   : > { %v909_v21 = vpop.permute.xlu0 %908  ;;  %v907_v22 = vpop.permute.xlu1 %906  ;;  %v985_v24 = vmul.f32 %v984_v23, %v2219_v51  ;;  %v986_v25 = vmul.f32 %v984_v23, %v2222_v20 }
 0x47e   : > { %v2235_v32 = vsel %vm910_vm15, %v907_v22, %v909_v21  ;;  %v2238_v33 = vsel %vm910_vm15, 0.0, %v907_v22 }
 0x47f   : > { %v987_v39 = vadd.f32 %v985_v24, %v982_v30  ;;  %v988_v40 = vadd.f32 %v986_v25, %v982_v30  ;;  %v991_v56 = vmul.f32 %v990_v31, %v2238_v33  ;;  %v992_v41 = vmul.f32 %v990_v31, %v2235_v32 }
 0x481   : > { %v918_v26 = vpop.permute.xlu0 %917  ;;  %v916_v29 = vpop.permute.xlu1 %915  ;;  %v993_v49 = vadd.f32 %v991_v56, %v987_v39  ;;  %v994_v53 = vadd.f32 %v992_v41, %v988_v40 }
 0x482   : > { %v920_v34 = vsel %vm919_vm0, %v916_v29, %v918_v26  ;;  %v923_v35 = vsel %vm919_vm0, 0.0, %v916_v29 }
 0x483   : > { %v2244_v37 = vmul.f32 %v2228_v27, %v923_v35  ;;  %v2247_v38 = vmul.f32 %v2230_v28, %v920_v34  ;;  %v1026_v34 = vstv %s2272_s30  ;;  %s1549_s30 = sld [smem:[#allocation7 + $0xb]] }
 0x485   : > { %v929_v42 = vpop.permute.xlu0 %928  ;;  %v927_v43 = vpop.permute.xlu1 %926  ;;  %v997_v44 = vmul.f32 %v996_v36, %v2244_v37  ;;  %v998_v45 = vmul.f32 %v996_v36, %v2247_v38 }
 0x486   : > { %v931_v46 = vsel %vm930_vm1, %v927_v43, %v929_v42  ;;  %v934_v47 = vsel %vm930_vm1, 0.0, %v927_v43 }
 0x487   : > { %v2263_v57 = vmul.f32 %v2206_v15, %v934_v47  ;;  %v2266_v58 = vmul.f32 %v2208_v17, %v931_v46  ;;  %v999_v62 = vadd.f32 %v997_v44, %v993_v49  ;;  %v1000_v1 = vadd.f32 %v998_v45, %v994_v53 }
 0x488   : > { %v1032_v53 = vstv %s2287_s27  ;;  %s1551_s27 = sld [smem:[#allocation7 + $0xd]] }
 0x489   : > { %v940_v59 = vpop.permute.xlu0 %939  ;;  %v938_v60 = vpop.permute.xlu1 %937  ;;  %v1003_v63 = vmul.f32 %v1002_v48, %v2263_v57  ;;  %v1004_v3 = vmul.f32 %v1002_v48, %v2266_v58 }
 0x48a   : > { %v945_v0 = vsel %vm941_vm2, %v940_v59, 0.0  ;;  %v942_v61 = vsel %vm941_vm2, %v938_v60, %v940_v59 }
 0x48b   : > { %v1005_v2 = vadd.f32 %v1003_v63, %v999_v62  ;;  %v1006_v7 = vadd.f32 %v1004_v3, %v1000_v1  ;;  %v2276_v6 = vmul.f32 %v2230_v28, %v945_v0  ;;  %v2279_v10 = vmul.f32 %v2228_v27, %v942_v61 }
 0x48c   : > { %v1174_v63 = vstv %s1547_s23  ;;  %s1552_s23 = sld [smem:[#allocation7 + $0xe]] }
 0x48d   : > { %v951_v11 = vpop.permute.xlu0 %950  ;;  %v949_v12 = vpop.permute.xlu1 %948  ;;  %v1012_v22 = vadd.f32 %v1010_v14, %v1006_v7  ;;  %v1016_v23 = vmul.f32 %v1014_v13, %v2276_v6  ;;  %v1011_v24 = vadd.f32 %v1009_v16, %v1005_v2  ;;  %v1015_v25 = vmul.f32 %v1014_v13, %v2279_v10 }
 0x48e   : > { %v956_v19 = vsel %vm952_vm3, %v951_v11, 0.0  ;;  %v953_v21 = vsel %vm952_vm3, %v949_v12, %v951_v11  ;;  %v1175_v2 = vmul.f32 %v1174_v63, %v2219_v51  ;;  %v1176_v7 = vmul.f32 %v1174_v63, %v2222_v20 }
 0x48f   : > { %v2292_v30 = vmul.f32 %v2208_v17, %v956_v19  ;;  %v2295_v31 = vmul.f32 %v2206_v15, %v953_v21  ;;  %v1018_v56 = vadd.f32 %v1016_v23, %v1012_v22  ;;  %v1017_v41 = vadd.f32 %v1015_v25, %v1011_v24 }
 0x490   : > { %v1172_v13 = vstv %s1546_s26  ;;  %v1180_v14 = vstv %s1548_s29  ;;  %v1186_v16 = vstv %s1549_s30  ;;  %v1192_v21 = vstv %s1550_s22  ;;  %s1553_s26 = sld [smem:[#allocation7 + $0xf]]  ;;  %s1554_s22 = sld [smem:[#allocation7 + $0x10]] }
 0x491   : > { %v962_v26 = vpop.permute.xlu0 %961  ;;  %v960_v29 = vpop.permute.xlu1 %959  ;;  %v1022_v39 = vmul.f32 %v1020_v18, %v2292_v30  ;;  %v1021_v40 = vmul.f32 %v1020_v18, %v2295_v31  ;;  %v1177_v18 = vadd.f32 %v1175_v2, %v1172_v13  ;;  %v1178_v19 = vadd.f32 %v1176_v7, %v1172_v13  ;;  %s1555_s29 = sld [smem:[#allocation7 + $0x11]]  ;;  %s2607_s30 = smov 112  }
 0x492   : > { %v2299_v35 = vsel %vm963_vm4, %v962_v26, 0.0  ;;  %v2302_v36 = vsel %vm963_vm4, %v960_v29, %v962_v26  ;;  %v1181_v51 = vmul.f32 %v1180_v14, %v2238_v33  ;;  %v1182_v20 = vmul.f32 %v1180_v14, %v2235_v32 }
 0x493   : > { %v1028_v44 = vmul.f32 %v1026_v34, %v2299_v35  ;;  %v1027_v45 = vmul.f32 %v1026_v34, %v2302_v36  ;;  %v1024_v46 = vadd.f32 %v1022_v39, %v1018_v56  ;;  %v1023_v47 = vadd.f32 %v1021_v40, %v1017_v41 }
 0x494   : > { %v1187_v22 = vmul.f32 %v1186_v16, %v2244_v37  ;;  %v1188_v23 = vmul.f32 %v1186_v16, %v2247_v38  ;;  %v1183_v24 = vadd.f32 %v1181_v51, %v1177_v18  ;;  %v1184_v25 = vadd.f32 %v1182_v20, %v1178_v19 }
 0x495   : > { %v971_v42 = vpop.permute.xlu0 %970  ;;  %v969_v43 = vpop.permute.xlu1 %968  ;;  %v1030_v0 = vadd.f32 %v1028_v44, %v1024_v46  ;;  %v1029_v61 = vadd.f32 %v1027_v45, %v1023_v47  ;;  %v1193_v26 = vmul.f32 %v1192_v21, %v2263_v57  ;;  %v1194_v33 = vmul.f32 %v1192_v21, %v2266_v58 }
 0x496   : > { %v976_v48 = vsel %vm972_vm5, %v971_v42, 0.0  ;;  %v973_v49 = vsel %vm972_vm5, %v969_v43, %v971_v42  ;;  %v1189_v32 = vadd.f32 %v1187_v22, %v1183_v24  ;;  %v1190_v29 = vadd.f32 %v1188_v23, %v1184_v25 }
 0x497   : > { %v2312_v59 = vmul.f32 %v2230_v28, %v976_v48  ;;  %v2315_v60 = vmul.f32 %v2228_v27, %v973_v49  ;;  %v1198_v37 = vstv %s1551_s27  ;;  %v1204_v39 = vstv %s1552_s23  ;;  %s2608_s27 = smov 111   ;;  %s2432_s23 = sld [smem:[#allocation10 + $0x4]] }
 0x498   : > { %v1195_v38 = vadd.f32 %v1193_v26, %v1189_v32  ;;  %v1196_v34 = vadd.f32 %v1194_v33, %v1190_v29  ;;  %v1200_v40 = vmul.f32 %v1198_v37, %v2170_v8  ;;  %v1199_v57 = vmul.f32 %v1198_v37, %v2168_v5 }
 0x499   : > { %v1034_v62 = vmul.f32 %v1032_v53, %v2312_v59  ;;  %v1033_v1 = vmul.f32 %v1032_v53, %v2315_v60  ;;  %v1210_v58 = vstv %s1553_s26  ;;  %v1206_v41 = vmul.f32 %v1204_v39, %v2276_v6  ;;  %s2437_s26 = sld [smem:[#allocation10 + $0x5]] }
 0x49a   : > { %v1202_v56 = vadd.f32 %v1200_v40, %v1196_v34  ;;  %v1201_v42 = vadd.f32 %v1199_v57, %v1195_v38  ;;  %v1205_v43 = vmul.f32 %v1204_v39, %v2279_v10  ;;  %v1212_v44 = vmul.f32 %v1210_v58, %v2292_v30 }
 0x49b   : > { %v1036_v3 = vadd.f32 %v1034_v62, %v1030_v0  ;;  %v1035_v4 = vadd.f32 %v1033_v1, %v1029_v61  ;;  %v1211_v45 = vmul.f32 %v1210_v58, %v2295_v31  ;;  %v1216_v8 = vstv %s1554_s22  ;;  %s2439_s22 = sld [smem:[#allocation10 + $0x6]] }
 0x49c   : > { %v1208_v5 = vadd.f32 %v1206_v41, %v1202_v56  ;;  %v1207_v46 = vadd.f32 %v1205_v43, %v1201_v42  ;;  %v1218_v47 = vmul.f32 %v1216_v8, %v2299_v35  ;;  %v1222_v48 = vstv %s1555_s29  ;;  %s2443_s29 = sld [smem:[#allocation10 + $0x7]] }
 0x49d   : > { %v2321_v11 = vmax.f32 %v1036_v3, 0.0  ;;  %v2323_v12 = vmax.f32 %v1035_v4, 0.0  ;;  %v1217_v10 = vmul.f32 %v1216_v8, %v2302_v36  ;;  %v1224_v30 = vmul.f32 %v1222_v48, %v2312_v59 }
 0x49e   : > { %v1214_v6 = vadd.f32 %v1212_v44, %v1208_v5  ;;  %v1213_v49 = vadd.f32 %v1211_v45, %v1207_v46  ;;  %v1223_v31 = vmul.f32 %v1222_v48, %v2315_v60 }
 0x49f   : > { %1044 = vrot.lane.b32.xlu0 %v2321_v11, %s1840_s28  ;;  %1042 = vrot.lane.b32.xlu1 %v2323_v12, %s1840_s28 }
 0x4a0   : > { %v1220_v53 = vadd.f32 %v1218_v47, %v1214_v6  ;;  %v1219_v0 = vadd.f32 %v1217_v10, %v1213_v49 }
 0x4a2   : > { %v1226_v35 = vadd.f32 %v1224_v30, %v1220_v53  ;;  %v1225_v36 = vadd.f32 %v1223_v31, %v1219_v0  ;;  %v1104_v53 = vstv %s2432_s23  ;;  %s2495_s23 = sld [smem:[#allocation10 + $0xf]] }
 0x4a3   : > { %1060 = vrot.lane.b32.xlu0 %v2321_v11, %s1841_s16  ;;  %1058 = vrot.lane.b32.xlu1 %v2323_v12, %s1841_s16 }
 0x4a4   : > { %v2373_v61 = vmax.f32 %v1226_v35, 0.0  ;;  %v2375_v59 = vmax.f32 %v1225_v36, 0.0 }
 0x4a7   : > { %1074 = vrot.lane.b32.xlu0 %v2321_v11, %s1842_s21  ;;  %1072 = vrot.lane.b32.xlu1 %v2323_v12, %s1842_s21 }
 0x4ab   : > { %1090 = vrot.lane.b32.xlu0 %v2321_v11, %s1843_s10  ;;  %1088 = vrot.lane.b32.xlu1 %v2323_v12, %s1843_s10 }
 0x4af   : > { %1112 = vrot.lane.b32.xlu0 %v2321_v11, %s1844_s18  ;;  %1110 = vrot.lane.b32.xlu1 %v2323_v12, %s1844_s18 }
 0x4b3   : > { %1128 = vrot.lane.b32.xlu0 %v2321_v11, %s1845_s19  ;;  %1126 = vrot.lane.b32.xlu1 %v2323_v12, %s1845_s19 }
 0x4b7   : > { %1144 = vrot.lane.b32.xlu0 %v2321_v11, %s2607_s30  ;;  %1142 = vrot.lane.b32.xlu1 %v2323_v12, %s2607_s30 }
 0x4bb   : > { %1158 = vrot.lane.b32.xlu0 %v2321_v11, %s2608_s27  ;;  %1156 = vrot.lane.b32.xlu1 %v2323_v12, %s2608_s27 }
 0x4bf   : > { %1234 = vrot.lane.b32.xlu0 %v2373_v61, %s1840_s28  ;;  %1232 = vrot.lane.b32.xlu1 %v2375_v59, %s1840_s28  ;;  %s1039_s28 = sld [smem:[#allocation10]] }
 0x4c3   : > { %1250 = vrot.lane.b32.xlu0 %v2373_v61, %s1841_s16  ;;  %1248 = vrot.lane.b32.xlu1 %v2375_v59, %s1841_s16 }
 0x4c5   : > { %v1052_v7 = vstv %s1039_s28  ;;  %s2465_s28 = sld [smem:[#allocation10 + $0xa]] }
 0x4c7   : > { %1264 = vrot.lane.b32.xlu0 %v2373_v61, %s1842_s21  ;;  %1262 = vrot.lane.b32.xlu1 %v2375_v59, %s1842_s21  ;;  %s2410_s21 = sld [smem:[#allocation2]] }
 0x4cb   : > { %1280 = vrot.lane.b32.xlu0 %v2373_v61, %s1843_s10  ;;  %1278 = vrot.lane.b32.xlu1 %v2375_v59, %s1843_s10  ;;  %s2412_s10 = sld [smem:[#allocation10 + $0x1]] }
 0x4cd   : > { %v980_v21 = vstv %s2410_s21  ;;  %s2470_s21 = sld [smem:[#allocation10 + $0xb]] }
 0x4cf   : > { %1302 = vrot.lane.b32.xlu0 %v2373_v61, %s1844_s18  ;;  %1300 = vrot.lane.b32.xlu1 %v2375_v59, %s1844_s18  ;;  %s2415_s18 = sld [smem:[#allocation10 + $0x2]] }
 0x4d1   : > { %v1066_v22 = vstv %s2412_s10  ;;  %s2477_s10 = sld [smem:[#allocation10 + $0xc]] }
 0x4d3   : > { %1318 = vrot.lane.b32.xlu0 %v2373_v61, %s1845_s19  ;;  %1316 = vrot.lane.b32.xlu1 %v2375_v59, %s1845_s19  ;;  %s2419_s19 = sld [smem:[#allocation10 + $0x3]] }
 0x4d5   : > { %v1082_v32 = vstv %s2415_s18  ;;  %s2479_s18 = sld [smem:[#allocation10 + $0xd]] }
 0x4d7   : > { %1334 = vrot.lane.b32.xlu0 %v2373_v61, %s2607_s30  ;;  %1332 = vrot.lane.b32.xlu1 %v2375_v59, %s2607_s30  ;;  %s2453_s30 = sld [smem:[#allocation10 + $0x8]] }
 0x4d9   : > { %v1098_v56 = vstv %s2419_s19  ;;  %s2489_s19 = sld [smem:[#allocation10 + $0xe]] }
 0x4db   : > { %1348 = vrot.lane.b32.xlu0 %v2373_v61, %s2608_s27  ;;  %1346 = vrot.lane.b32.xlu1 %v2375_v59, %s2608_s27  ;;  %s2458_s27 = sld [smem:[#allocation10 + $0x9]] }
 0x511   : > { %v1045_v60 = vpop.permute.xlu0 %1044  ;;  %v1043_v62 = vpop.permute.xlu1 %1042 }
 0x512   : > { %v1046_v1 = vsel %vm899_vm12, %v1043_v62, %v1045_v60  ;;  %v1049_v63 = vsel %vm899_vm12, 0.0, %v1043_v62 }
 0x513   : > { %v1051_v2 = vmul.f32 %v2208_v17, %v1046_v1  ;;  %v1050_v13 = vmul.f32 %v2206_v15, %v1049_v63  ;;  %v1120_v1 = vstv %s2437_s26  ;;  %s1563_s26 = sld [smem:[#allocation10 + $0x10]] }
 0x515   : > { %v1061_v3 = vpop.permute.xlu0 %1060  ;;  %v1059_v4 = vpop.permute.xlu1 %1058  ;;  %v1054_v19 = vmul.f32 %v1052_v7, %v1051_v2  ;;  %v1053_v20 = vmul.f32 %v1052_v7, %v1050_v13  ;;  %v1105_v13 = vmul.f32 %v1104_v53, %v2323_v12 }
 0x516   : > { %v1062_v23 = vsel %vm910_vm15, %v1059_v4, %v1061_v3  ;;  %v1065_v24 = vsel %vm910_vm15, 0.0, %v1059_v4  ;;  %v1106_v3 = vmul.f32 %v1104_v53, %v2321_v11  ;;  %v1150_v11 = vstv %s2443_s29  ;;  %s1573_s29 = sshll.u32 %s1925_s8, 9  ;;  %s1390_s8 = scalar_lea.sflag [#allocation5], %s2053_s15 }
 0x517   : > { %v1056_v34 = vadd.f32 %v1054_v19, %v980_v21  ;;  %v1068_v39 = vmul.f32 %v1066_v22, %v1062_v23  ;;  %v1055_v57 = vadd.f32 %v1053_v20, %v980_v21  ;;  %v1067_v58 = vmul.f32 %v1066_v22, %v1065_v24 }
 0x519   : > { %v1075_v14 = vpop.permute.xlu0 %1074  ;;  %v1073_v16 = vpop.permute.xlu1 %1072  ;;  %v1070_v8 = vadd.f32 %v1068_v39, %v1056_v34  ;;  %v1069_v46 = vadd.f32 %v1067_v58, %v1055_v57 }
 0x51a   : > { %v1076_v18 = vsel %vm919_vm0, %v1073_v16, %v1075_v14  ;;  %v1079_v51 = vsel %vm919_vm0, 0.0, %v1073_v16  ;;  %v1136_v14 = vstv %s2439_s22  ;;  %s1564_s22 = sld [smem:[#allocation10 + $0x11]] }
 0x51b   : > { %v1081_v25 = vmul.f32 %v2230_v28, %v1076_v18  ;;  %v1080_v29 = vmul.f32 %v2228_v27, %v1079_v51 }
 0x51d   : > { %v1091_v26 = vpop.permute.xlu0 %1090  ;;  %v1089_v33 = vpop.permute.xlu1 %1088  ;;  %v1084_v42 = vmul.f32 %v1082_v32, %v1081_v25  ;;  %v1083_v45 = vmul.f32 %v1082_v32, %v1080_v29 }
 0x51e   : > { %v1092_v37 = vsel %vm930_vm1, %v1089_v33, %v1091_v26  ;;  %v1095_v38 = vsel %vm930_vm1, 0.0, %v1089_v33 }
 0x51f   : > { %v1097_v40 = vmul.f32 %v2208_v17, %v1092_v37  ;;  %v1096_v41 = vmul.f32 %v2206_v15, %v1095_v38  ;;  %v1086_v6 = vadd.f32 %v1084_v42, %v1070_v8  ;;  %v1085_v31 = vadd.f32 %v1083_v45, %v1069_v46 }
 0x521   : > { %v1113_v43 = vpop.permute.xlu0 %1112  ;;  %v1111_v44 = vpop.permute.xlu1 %1110  ;;  %v1100_v5 = vmul.f32 %v1098_v56, %v1097_v40  ;;  %v1099_v47 = vmul.f32 %v1098_v56, %v1096_v41  ;;  %v1166_v40 = vstv %s2453_s30  ;;  %s2609_s30 = sshll.u32 %s2053_s15, 5 }
 0x522   : > { %v1117_v48 = vsel %vm941_vm2, %v1113_v43, 0.0  ;;  %v1114_v49 = vsel %vm941_vm2, %v1111_v44, %v1113_v43  ;;  %v1242_v44 = vstv %s2458_s27  ;;  %s390_s27 = scalar_lea.vmem [#allocation11], %s2609_s30 }
 0x523   : > { %v1102_v35 = vadd.f32 %v1100_v5, %v1086_v6  ;;  %v1119_v36 = vmul.f32 %v2230_v28, %v1117_v48  ;;  %v1101_v62 = vadd.f32 %v1099_v47, %v1085_v31  ;;  %v1118_v63 = vmul.f32 %v2228_v27, %v1114_v49 }
 0x524   : > { %v1256_v31 = vstv %s2465_s28  ;;  %s1403_s28 = sshll.u32 %s390_s27, 4  ;;  %s2531_s28 = int_to_ptr.vmem [resolvable:$true] %s1403_s28 }
 0x525   : > { %v1129_v10 = vpop.permute.xlu0 %1128  ;;  %v1127_v30 = vpop.permute.xlu1 %1126  ;;  %v1108_v18 = vadd.f32 %v1106_v3, %v1102_v35  ;;  %v1122_v19 = vmul.f32 %v1120_v1, %v1119_v36  ;;  %v1107_v51 = vadd.f32 %v1105_v13, %v1101_v62  ;;  %v1121_v20 = vmul.f32 %v1120_v1, %v1118_v63 }
 0x526   : > { %v1133_v0 = vsel %vm952_vm3, %v1129_v10, 0.0  ;;  %v1130_v60 = vsel %vm952_vm3, %v1127_v30, %v1129_v10  ;;  %v1272_v62 = vstv %s2470_s21 }
 0x527   : > { %v1135_v4 = vmul.f32 %v2208_v17, %v1133_v0  ;;  %v1134_v16 = vmul.f32 %v2206_v15, %v1130_v60  ;;  %v1124_v33 = vadd.f32 %v1122_v19, %v1108_v18  ;;  %v1123_v29 = vadd.f32 %v1121_v20, %v1107_v51 }
 0x529   : > { %v1145_v2 = vpop.permute.xlu0 %1144  ;;  %v1143_v7 = vpop.permute.xlu1 %1142  ;;  %v1138_v21 = vmul.f32 %v1136_v14, %v1135_v4  ;;  %v1137_v24 = vmul.f32 %v1136_v14, %v1134_v16 }
 0x52a   : > { %v1149_v25 = vsel %vm963_vm4, %v1145_v2, 0.0  ;;  %v1146_v32 = vsel %vm963_vm4, %v1143_v7, %v1145_v2 }
 0x52b   : > { %v1140_v34 = vadd.f32 %v1138_v21, %v1124_v33  ;;  %v1152_v39 = vmul.f32 %v1150_v11, %v1149_v25  ;;  %v1139_v56 = vadd.f32 %v1137_v24, %v1123_v29  ;;  %v1151_v41 = vmul.f32 %v1150_v11, %v1146_v32 }
 0x52c   : > { %v1288_v21 = vstv %s2477_s10 }
 0x52d   : > { %v1159_v22 = vpop.permute.xlu0 %1158  ;;  %v1157_v23 = vpop.permute.xlu1 %1156  ;;  %v1154_v6 = vadd.f32 %v1152_v39, %v1140_v34  ;;  %v1153_v49 = vadd.f32 %v1151_v41, %v1139_v56 }
 0x52e   : > { %v1163_v26 = vsel %vm972_vm5, %v1159_v22, 0.0  ;;  %v1160_v12 = vsel %vm972_vm5, %v1157_v23, %v1159_v22  ;;  %v1294_v23 = vstv %s2479_s18  ;;  %s2527_s18 = scalar_lea.hbm %s2585_s9, %s1573_s29 }
 0x52f   : > { %v1165_v37 = vmul.f32 %v2230_v28, %v1163_v26  ;;  %v1164_v38 = vmul.f32 %v2228_v27, %v1160_v12  ;;  %v1296_v39 = vmul.f32 %v1294_v23, %v2373_v61 }
 0x531   : > { %v1235_v57 = vpop.permute.xlu0 %1234  ;;  %v1233_v58 = vpop.permute.xlu1 %1232  ;;  %v1168_v5 = vmul.f32 %v1166_v40, %v1165_v37  ;;  %v1167_v46 = vmul.f32 %v1166_v40, %v1164_v38 }
 0x532   : > { %v1236_v42 = vsel %vm899_vm12, %v1233_v58, %v1235_v57  ;;  %v1239_v43 = vsel %vm899_vm12, 0.0, %v1233_v58  ;;  %v1295_v57 = vmul.f32 %v1294_v23, %v2375_v59 }
 0x533   : > { %v1240_v45 = vmul.f32 %v2206_v15, %v1239_v43  ;;  %v1241_v8 = vmul.f32 %v2208_v17, %v1236_v42  ;;  %v1170_v53 = vadd.f32 %v1168_v5, %v1154_v6  ;;  %v1169_v0 = vadd.f32 %v1167_v46, %v1153_v49 }
 0x535   : > { %v1251_v47 = vpop.permute.xlu0 %1250  ;;  %v1249_v48 = vpop.permute.xlu1 %1248  ;;  %v1243_v10 = vmul.f32 %v1242_v44, %v1240_v45  ;;  %v1244_v30 = vmul.f32 %v1242_v44, %v1241_v8  ;;  %v1310_v44 = vstv %s2489_s19  ;;  %s1757_s19 = scalar_lea.vmem %s2531_s28, 512 }
 0x536   : > { %v1252_v35 = vsel %vm910_vm15, %v1249_v48, %v1251_v47  ;;  %v1255_v36 = vsel %vm910_vm15, 0.0, %v1249_v48  ;;  %v1326_v47 = vstv %s2495_s23  ;;  %p1758_p12 = scmp.ne.s32.totalorder %s2531_s28, %s1757_s19  ;;  %s1849_s23 = smov [#allocation11]  }
 0x537   : > { %v1246_v63 = vadd.f32 %v1244_v30, %v1170_v53  ;;  %v1245_v3 = vadd.f32 %v1243_v10, %v1169_v0  ;;  %v1257_v7 = vmul.f32 %v1256_v31, %v1255_v36  ;;  %v1258_v13 = vmul.f32 %v1256_v31, %v1252_v35 }
 0x538   : > { %v1340_v35 = vstv %s1563_s26  ;;  %p1759_p0 = pnand %p1758_p12, %p2005_p9  ;;  %s1761_s26 = sshll.u32 %s1849_s23, 4  ;;  %s1762_s26 = int_to_ptr.vmem [resolvable:$false] %s1761_s26 }
 0x539   : > { %v1265_v60 = vpop.permute.xlu0 %1264  ;;  %v1263_v1 = vpop.permute.xlu1 %1262  ;;  %v1259_v24 = vadd.f32 %v1257_v7, %v1245_v3  ;;  %v1260_v25 = vadd.f32 %v1258_v13, %v1246_v63  ;;  %p1764_p2 = scmp.lt.s32.totalorder %s2531_s28, %s1762_s26 }
 0x53a   : > { %v1266_v4 = vsel %vm919_vm0, %v1263_v1, %v1265_v60  ;;  %v1269_v2 = vsel %vm919_vm0, 0.0, %v1263_v1  ;;  %p1760_p3 = pneg %p1759_p0 }
 0x53b   : > { %v1270_v14 = vmul.f32 %v2228_v27, %v1269_v2  ;;  %v1271_v16 = vmul.f32 %v2230_v28, %v1266_v4 }
 0x53d   : > { %v1273_v18 = vmul.f32 %v1272_v62, %v1270_v14  ;;  %v1274_v19 = vmul.f32 %v1272_v62, %v1271_v16  ;;  %v1281_v51 = vpop.permute.xlu0 %1280  ;;  %v1279_v20 = vpop.permute.xlu1 %1278 }
 0x53e   : > { %v1282_v11 = vsel %vm930_vm1, %v1279_v20, %v1281_v51  ;;  %v1285_v22 = vsel %vm930_vm1, 0.0, %v1279_v20 }
 0x53f   : > { %v1286_v26 = vmul.f32 %v2206_v15, %v1285_v22  ;;  %v1287_v12 = vmul.f32 %v2208_v17, %v1282_v11  ;;  %v1275_v33 = vadd.f32 %v1273_v18, %v1259_v24  ;;  %v1276_v32 = vadd.f32 %v1274_v19, %v1260_v25 }
 0x541   : > { %v1289_v29 = vmul.f32 %v1288_v21, %v1286_v26  ;;  %v1290_v37 = vmul.f32 %v1288_v21, %v1287_v12  ;;  %v1303_v38 = vpop.permute.xlu0 %1302  ;;  %v1301_v34 = vpop.permute.xlu1 %1300 }
 0x542   : > { %v1307_v40 = vsel %vm941_vm2, %v1303_v38, 0.0  ;;  %v1304_v58 = vsel %vm941_vm2, %v1301_v34, %v1303_v38 }
 0x543   : > { %v1291_v56 = vadd.f32 %v1289_v29, %v1275_v33  ;;  %v1292_v41 = vadd.f32 %v1290_v37, %v1276_v32  ;;  %v1309_v42 = vmul.f32 %v2230_v28, %v1307_v40  ;;  %v1308_v43 = vmul.f32 %v2228_v27, %v1304_v58 }
 0x545   : > { %v1298_v45 = vadd.f32 %v1296_v39, %v1292_v41  ;;  %v1297_v8 = vadd.f32 %v1295_v57, %v1291_v56  ;;  %v1319_v5 = vpop.permute.xlu0 %1318  ;;  %v1317_v46 = vpop.permute.xlu1 %1316  ;;  %v1312_v59 = vmul.f32 %v1310_v44, %v1309_v42  ;;  %v1311_v6 = vmul.f32 %v1310_v44, %v1308_v43 }
 0x546   : > { %v1323_v61 = vsel %vm952_vm3, %v1319_v5, 0.0  ;;  %v1320_v48 = vsel %vm952_vm3, %v1317_v46, %v1319_v5 }
 0x547   : > { %v1325_v49 = vmul.f32 %v2208_v17, %v1323_v61  ;;  %v1324_v10 = vmul.f32 %v2206_v15, %v1320_v48  ;;  %v1314_v62 = vadd.f32 %v1312_v59, %v1298_v45  ;;  %v1313_v1 = vadd.f32 %v1311_v6, %v1297_v8 }
 0x548   : > { %v1356_v17 = vstv %s1564_s22  ;;  %s1763_s22 = scalar_lea.vmem %s1762_s26, 1024 }
 0x549   : > { %v1328_v30 = vmul.f32 %v1326_v47, %v1325_v49  ;;  %v1327_v31 = vmul.f32 %v1326_v47, %v1324_v10  ;;  %v1335_v53 = vpop.permute.xlu0 %1334  ;;  %v1333_v0 = vpop.permute.xlu1 %1332  ;;  %p1765_p4 = scmp.lt.s32.totalorder %s1763_s22, %s1757_s19 }
 0x54a   : > { %v1339_v36 = vsel %vm963_vm4, %v1335_v53, 0.0  ;;  %v1336_v60 = vsel %vm963_vm4, %v1333_v0, %v1335_v53 }
 0x54b   : > { %v1330_v63 = vadd.f32 %v1328_v30, %v1314_v62  ;;  %v1342_v3 = vmul.f32 %v1340_v35, %v1339_v36  ;;  %v1329_v4 = vadd.f32 %v1327_v31, %v1313_v1  ;;  %v1341_v2 = vmul.f32 %v1340_v35, %v1336_v60  ;;  %p1766_p6 = por %p1765_p4, %p1764_p2 }
 0x54d   : > { %v1349_v7 = vpop.permute.xlu0 %1348  ;;  %v1347_v13 = vpop.permute.xlu1 %1346  ;;  %v1344_v19 = vadd.f32 %v1342_v3, %v1330_v63  ;;  %v1343_v51 = vadd.f32 %v1341_v2, %v1329_v4  ;;  %p1767_p8 = pnand %p1766_p6, %p1760_p3 }
 0x54e   : > { %v1353_v15 = vsel %vm972_vm5, %v1349_v7, 0.0  ;;  %v1350_v14 = vsel %vm972_vm5, %v1347_v13, %v1349_v7 }
 0x54f   : > { %v1355_v16 = vmul.f32 %v2230_v28, %v1353_v15  ;;  %v1354_v18 = vmul.f32 %v2228_v27, %v1350_v14 }
 0x551   : > { %v1358_v20 = vmul.f32 %v1356_v17, %v1355_v16  ;;  %v1357_v21 = vmul.f32 %v1356_v17, %v1354_v18 }
 0x553   : > { %v1360_v11 = vadd.f32 %v1358_v20, %v1344_v19  ;;  %v1359_v22 = vadd.f32 %v1357_v21, %v1343_v51 }
 0x555   : > { %v1566_v23 = vmul.f32 -1.442695, %v1360_v11  ;;  %v1565_v24 = vmul.f32 -1.442695, %v1359_v22 }
 0x557   : > { %1674 = vpow2.f32 %v1566_v23 }
 0x558   : > { %1676 = vpow2.f32 %v1565_v24 }
 0x561   : > { %v1675_v25 = vpop.eup %1674 }
 0x562   : > { %v1677_v26 = vpop.eup %1676  ;;  %v1368_v12 = vadd.f32 1.0, %v1675_v25 }
 0x563   : > { %v1367_v33 = vadd.f32 1.0, %v1677_v26 }
 0x564   : > { %1678 = vrcp.f32 %v1368_v12 }
 0x565   : > { %1680 = vrcp.f32 %v1367_v33 }
 0x56e   : > { %v1679_v28 = vpop.eup %1678 }
 0x56f   : > { %v1681_v27 = vpop.eup %1680  ;;  %v1380_v32 = vrot.slane %v1679_v28, %v2090_v9 }
 0x570   : > { %v1376_v29 = vrot.slane %v1681_v27, %v2090_v9 }
 0x571   : > { %v1382_v37 = vmul.f32 %v1380_v32, %v2156_v52  ;;  %v1384_v38 = vmul.f32 %v1380_v32, %v2162_v55 }
 0x572   : > { %v1381_v34 = vmul.f32 %v1376_v29, %v2153_v50  ;;  %v1383_v39 = vmul.f32 %v1376_v29, %v2159_v54 }
 0x573   : > { %1386 = vst [vmem:[%s390_s27 + $0x8] sm:$0xff] %v1382_v37  ;;  %1388 = vst [vmem:[%s390_s27 + $0x18] sm:$0xff] %v1384_v38 }
 0x574   : > { %1385 = vst [vmem:[%s390_s27] sm:$0xff] %v1381_v34  ;;  %1387 = vst [vmem:[%s390_s27 + $0x10] sm:$0xff] %v1383_v39 }
 0x575   : > { %1770 = shalt.err (!%p1767_p8)
}
 0x576   : > { %s1771_s29 = scalar_lea.hbm %s2527_s18, 512  ;;  %s1775_s21 = scalar_lea.hbm %s2585_s9, 1024 }
 0x577   : > { %p1772_p1 = scmp.ne.s32.totalorder %s2527_s18, %s1771_s29  ;;  %p1776_p13 = scmp.lt.u32.totalorder %s2527_s18, %s2585_s9 }
 0x578   : > { %p1777_p7 = scmp.lt.u32.totalorder %s1775_s21, %s1771_s29  ;;  %p1779_p12 = scmp.lt.u32.totalorder %s1771_s29, %s2527_s18 }
 0x579   : > { %p1773_p5 = pnand %p1772_p1, %p2005_p9 }
 0x57a   : > { %p1778_p10 = por %p1777_p7, %p1776_p13 }
 0x57b   : > { %p1774_p11 = pneg %p1773_p5 }
 0x57c   : > { %p1780_p0 = por %p1779_p12, %p1778_p10 }
 0x57e   : > { %p1781_p3 = pnand %p1780_p0, %p1774_p11 }
 0x580   : > { %1784 = shalt.err (!%p1781_p3)
}
 0x581   : > { %s1850_s19 = smov 256  }
 0x582   : > { %1588 = dma.vmem_to_hbm [thread:$0]  (%p2005_p9), %s2531_s28, 512, %s2527_s18, %s1390_s8, %s1850_s19, %s1850_s19, %s1841_s16  }
 0x583 PF: > { %s1418_s26 = sand.u32 1, %s1819_s11   ;;  %p2610_p2 = scmp.ne.s32.totalorder %s2595_s17, 0 }
 0x584   : > { %p2611_p4 = scmp.ge.s32.totalorder %s1831_s14, 2  ;;  %s1419_s22 = scalar_lea.sflag [#allocation5], %s1418_s26 }
 0x586   : > { %p1605_p6 = pnand %p2611_p4, %p2610_p2 }
 0x588   : > { %1814 = dma.done.wait (!%p1605_p6), %s1419_s22, 512  }
 0x589   : > { %1816 = vsyncadd (!%p1605_p6), %s1419_s22, 4294966784  ;;  %p25_p8 = scmp.ge.s32.totalorder %s1991_s20, 4   ;;  %s2612_s11 = smov %s1823_s12 }
 0x58a   : > { %s2613_s12 = smov %s1827_s13  ;;  %s2614_s13 = smov %s2001_s24 }
 0x58b   : > { %s2615_s14 = smov %s1991_s20  ;;  %27 = sbr.rel (!%p25_p8) target bundleno = 9 (0x9), region = 114 }
 0x592   :  { %1424 = vsyncpa [#allocation4], 1 }
 0x593   :  { %1426 = vsyncpa [#allocation4 + $0x1], 1 }
 0x594   :  { %1427 = vsyncpa [#allocation5], 1 }
 0x595   :  { %1429 = vsyncpa [#allocation5 + $0x1], 1 }
 0x596   :  { %1430 = vsyncpa [#allocation6], 1 }
 0x597   :  { %1432 = vsyncpa [#allocation6 + $0x1], 1 }
 0x598   :  { %1433 = vsyncpa [#allocation9], 1 }

</bundles_post_ra>
